<compile_context>
chip_gen: v6e
topology: v6e:2x2x1
jax: 0.10.0
libtpu: 0.0.40
codegen_flags: <defaults>
</compile_context>

<pallas_src>
import math
import functools

import jax
import jax.numpy as jnp
from jax.experimental import pallas as pl
from jax.experimental.pallas import tpu as pltpu

# ----------------------------- config (synthetic, small) -----------------------------
B = 2            # batch
S = 16           # sequence length
HIDDEN = 32      # hidden_size
H = 4            # num_attention_heads
D = HIDDEN // H  # head_dim = 8
KVH = 2          # num_key_value_heads
GROUP = H // KVH # q heads per kv head
THETA = 100000.0 # rope_theta
CONV_WINDOW = 2
SCALE = 1.0 / math.sqrt(D)
# sliding_window_layers = [] -> is_swa=False, no sliding window in this layer.


# ----------------------------- fused forward kernel -----------------------------
def _fused_kernel(x_ref, wqkv_ref, wo_ref, cos2_ref, sin2_ref, rotp_ref,
                  shift_ref, mask_ref, ck_ref, cv_ref, o_ref,
                  *, scale, n_heads, n_kv, group, s, hidden):
    f32 = jnp.float32
    bf16 = jnp.bfloat16
    dn = (((1,), (1,)), ((), ()))   # contract dim 1 of both operands (x @ W^T style)

    xb = x_ref[0].astype(bf16)            # (S, HIDDEN)
    cos2 = cos2_ref[...]                  # (GROUP*S, D) duplicated-half tables
    sin2 = sin2_ref[...]
    cos1 = cos2[:s]                       # (S, D) (aligned sublane slice)
    sin1 = sin2[:s]
    rotp = rotp_ref[...]                  # (D, D)  x @ rotp == rotate_half(x)
    shift = shift_ref[...]                # (S, S)  sub-diagonal: (shift @ x)[t] = x[t-1]
    madd = mask_ref[...]                  # (GROUP*S, S) additive causal mask (0 / -1e30)

    out = jnp.zeros((s, hidden), f32)
    for g in range(n_kv):
        # ---- K / V projections for this kv head (W_pack rows: q heads | k heads | v heads)
        wk = wqkv_ref[n_heads + g]                 # (D, HIDDEN) bf16
        wv = wqkv_ref[n_heads + n_kv + g]
        kg = jax.lax.dot_general(xb, wk, dn, preferred_element_type=f32)   # (S, D)
        vg = jax.lax.dot_general(xb, wv, dn, preferred_element_type=f32)

        # ---- causal window-2 depthwise conv along seq (once per kv head, not per q head)
        kprev = jnp.dot(shift, kg, preferred_element_type=f32)
        vprev = jnp.dot(shift, vg, preferred_element_type=f32)
        kg = ck_ref[g, 0] * kprev + ck_ref[g, 1] * kg
        vg = cv_ref[g, 0] * vprev + cv_ref[g, 1] * vg

        # ---- RoPE on K (once per kv head)
        kg = kg * cos1 + jnp.dot(kg, rotp, preferred_element_type=f32) * sin1

        # ---- stack this kv head's GROUP query heads along sublanes and apply RoPE
        q_heads = []
        for j in range(group):
            wq = wqkv_ref[g * group + j]                                    # (D, HIDDEN)
            q_heads.append(jax.lax.dot_general(xb, wq, dn,
                                               preferred_element_type=f32))  # (S, D)
        q_st = jnp.concatenate(q_heads, axis=0)                             # (GROUP*S, D)
        q_st = q_st * cos2 + jnp.dot(q_st, rotp, preferred_element_type=f32) * sin2

        # ---- causal softmax attention for all GROUP heads at once (bf16 MXU, f32 softmax)
        sc = jax.lax.dot_general(q_st.astype(bf16), kg.astype(bf16), dn,
                                 preferred_element_type=f32) * scale + madd  # (GROUP*S, S)
        m = jnp.max(sc, axis=-1, keepdims=True)
        p = jnp.exp(sc - m)
        l = jnp.sum(p, axis=-1, keepdims=True)
        o_st = jnp.dot(p.astype(bf16), vg.astype(bf16),
                       preferred_element_type=f32)                           # (GROUP*S, D)
        o_st = o_st * pl.reciprocal(l, approx=True)

        # ---- o_proj, accumulated per head (keeps the only HBM write lane-dense)
        for j in range(group):
            oh = o_st[j * s:(j + 1) * s]                                     # (S, D)
            woh = wo_ref[g * group + j]                                      # (HIDDEN, D)
            out = out + jax.lax.dot_general(oh.astype(bf16), woh, dn,
                                            preferred_element_type=f32)

    o_ref[0] = out.astype(o_ref.dtype)
    # TODO(synk): real Baichuan shapes (D=128, S in the thousands, HIDDEN~5120) need a
    # K-tiled accumulator for the projections and a flash-style KV-tiled online-softmax
    # loop sized for v7x's 64 MiB VMEM; this whole-sequence block only targets toy sizes.


# ----------------------------- full forward -----------------------------
def baichuan_flash_attention2_forward(hidden_states, w_pack, w_o, conv_k, conv_v):
    """hidden_states:(B,S,HIDDEN); w_pack:((H+2*KVH)*D, HIDDEN); w_o:(HIDDEN,HIDDEN);
    conv_k/conv_v:(KVH, 2) (the PyTorch (1,1,KVH,1,2) params squeezed)."""
    bsz, q_len, hid = hidden_states.shape
    n_total = H + 2 * KVH

    # W_pack in stored (out, in) layout, reshaped head-major: (n_total, D, HIDDEN). No transpose.
    wqkv = w_pack.reshape(n_total, D, hid).astype(jnp.bfloat16)
    # o_proj in stored (out, in) layout with its in-dim split head-major -> (H, HIDDEN, D)
    # so the kernel accumulates per-head partial products (no in-kernel lane slicing).
    wo_h = jnp.transpose(w_o.reshape(hid, H, D), (1, 0, 2)).astype(jnp.bfloat16)

    # RoPE tables (seqlen_offset = 0; no cache), duplicated halves, tiled for GROUP-stacked q.
    inv_freq = 1.0 / (THETA ** (jnp.arange(0, D, 2, dtype=jnp.float32) / D))
    freqs = jnp.outer(jnp.arange(q_len, dtype=jnp.float32), inv_freq)      # (S, D/2)
    cosf = jnp.concatenate([jnp.cos(freqs), jnp.cos(freqs)], axis=-1)      # (S, D)
    sinf = jnp.concatenate([jnp.sin(freqs), jnp.sin(freqs)], axis=-1)
    cos2 = jnp.tile(cosf, (GROUP, 1))                                      # (GROUP*S, D)
    sin2 = jnp.tile(sinf, (GROUP, 1))

    # Precomputed constants (hoisted out of the kernel body).
    half = D // 2
    r = jnp.arange(D)
    rotp = (jnp.where(r[:, None] == r[None, :] + half, -1.0, 0.0)
            + jnp.where(r[None, :] == r[:, None] + half, 1.0, 0.0)).astype(jnp.float32)
    si = jnp.arange(q_len)
    shiftm = (si[:, None] == si[None, :] + 1).astype(jnp.float32)          # (S,S) sub-diagonal
    causal = si[None, :] <= si[:, None]
    maskadd = jnp.tile(jnp.where(causal, 0.0, -1e30).astype(jnp.float32), (GROUP, 1))

    kernel = functools.partial(_fused_kernel, scale=SCALE, n_heads=H, n_kv=KVH,
                               group=GROUP, s=q_len, hidden=hid)

    out = pl.pallas_call(
        kernel,
        out_shape=jax.ShapeDtypeStruct((bsz, q_len, hid), jnp.float32),
        grid=(bsz,),
        in_specs=[
            pl.BlockSpec((1, q_len, hid), lambda b: (b, 0, 0)),            # hidden_states
            pl.BlockSpec((n_total, D, hid), lambda b: (0, 0, 0)),          # W_pack (head-major)
            pl.BlockSpec((H, hid, D), lambda b: (0, 0, 0)),                # o_proj (head-major)
            pl.BlockSpec((GROUP * q_len, D), lambda b: (0, 0)),            # cos
            pl.BlockSpec((GROUP * q_len, D), lambda b: (0, 0)),            # sin
            pl.BlockSpec((D, D), lambda b: (0, 0)),                        # rotate_half perm
            pl.BlockSpec((q_len, q_len), lambda b: (0, 0)),                # seq shift matrix
            pl.BlockSpec((GROUP * q_len, q_len), lambda b: (0, 0)),        # causal additive mask
            pl.BlockSpec(memory_space=pltpu.MemorySpace.SMEM),             # conv_k scalars
            pl.BlockSpec(memory_space=pltpu.MemorySpace.SMEM),             # conv_v scalars
        ],
        out_specs=pl.BlockSpec((1, q_len, hid), lambda b: (b, 0, 0)),
        compiler_params=pltpu.CompilerParams(dimension_semantics=("parallel",)),
    )(hidden_states, wqkv, wo_h, cos2, sin2, rotp, shiftm, maskadd,
      conv_k.astype(jnp.float32), conv_v.astype(jnp.float32))
    return out
    # TODO(synk): varlen (seqlens/cu_seqlens), KV-cache decode step, sliding-window and
    # dropout branches of the PyTorch forward are not exercised by this prefill kernel.


# ----------------------------- pure-JAX reference (mirrors PyTorch semantics) -----------------------------
def reference_forward(x, w_pack, w_o, conv_k, conv_v):
    bsz, q_len, hid = x.shape
    proj = x @ w_pack.T
    proj4 = proj.reshape(bsz, q_len, H + 2 * KVH, D)
    q = proj4[:, :, :H]
    k = proj4[:, :, H:H + KVH]
    v = proj4[:, :, H + KVH:]

    def conv(u, w):  # u (B,S,KVH,D), w (KVH,2)  == custom_convolution with window 2
        u_prev = jnp.concatenate([jnp.zeros_like(u[:, :1]), u[:, :-1]], axis=1)
        return w[None, None, :, 0:1] * u_prev + w[None, None, :, 1:2] * u

    k = conv(k, conv_k)
    v = conv(v, conv_v)

    inv_freq = 1.0 / (THETA ** (jnp.arange(0, D, 2, dtype=jnp.float32) / D))
    freqs = jnp.outer(jnp.arange(q_len, dtype=jnp.float32), inv_freq)
    cos = jnp.cos(freqs)[None, :, None, :]
    sin = jnp.sin(freqs)[None, :, None, :]

    def rope(t):
        t1, t2 = t[..., :D // 2], t[..., D // 2:]
        return jnp.concatenate([t1 * cos - t2 * sin, t2 * cos + t1 * sin], axis=-1)

    q = rope(q)
    k = rope(k)

    kr = jnp.repeat(k, GROUP, axis=2)
    vr = jnp.repeat(v, GROUP, axis=2)
    s = jnp.einsum('bqhd,bkhd->bhqk', q, kr) * SCALE
    mask = jnp.tril(jnp.ones((q_len, q_len), bool))
    s = jnp.where(mask[None, None], s, -jnp.inf)
    p = jax.nn.softmax(s, axis=-1)
    o = jnp.einsum('bhqk,bkhd->bqhd', p, vr).reshape(bsz, q_len, hid)
    return o @ w_o.T


# ----------------------------- main -----------------------------
if __name__ == "__main__":
    key = jax.random.PRNGKey(0)
    k1, k2, k3, k4, k5 = jax.random.split(key, 5)

    hidden_states = jax.random.normal(k1, (B, S, HIDDEN), jnp.float32)
    w_pack = jax.random.normal(k2, (HIDDEN + 2 * KVH * D, HIDDEN), jnp.float32) / math.sqrt(HIDDEN)
    w_o = jax.random.normal(k3, (HIDDEN, HIDDEN), jnp.float32) / math.sqrt(HIDDEN)
    # nn.Parameter(softmax(randn(1,1,KVH,1,2), dim=-1)) squeezed to (KVH, 2)
    conv_k = jax.nn.softmax(jax.random.normal(k4, (KVH, CONV_WINDOW), jnp.float32), axis=-1)
    conv_v = jax.nn.softmax(jax.random.normal(k5, (KVH, CONV_WINDOW), jnp.float32), axis=-1)

    fwd = jax.jit(baichuan_flash_attention2_forward)
    out = fwd(hidden_states, w_pack, w_o, conv_k, conv_v)
    out = jax.block_until_ready(out)

    ref = reference_forward(hidden_states, w_pack, w_o, conv_k, conv_v)
    assert out.shape == (B, S, HIDDEN), out.shape
    if not bool(jnp.allclose(out, ref, atol=5e-2, rtol=5e-2)):
        max_err = float(jnp.max(jnp.abs(out - ref)))
        raise AssertionError(f"Pallas output mismatch vs reference, max_abs_err={max_err}")
    print("KERNEL_OK")
</pallas_src>

<mosaic_0001>
module attributes {stable_mosaic.version = 11 : i64} {
  func.func @_fused_kernel(%arg0: i32, %arg1: memref<1x16x32xf32, #tpu.memory_space<vmem>>, %arg2: memref<8x8x32xbf16, #tpu.memory_space<vmem>>, %arg3: memref<4x32x8xbf16, #tpu.memory_space<vmem>>, %arg4: memref<32x8xf32, #tpu.memory_space<vmem>>, %arg5: memref<32x8xf32, #tpu.memory_space<vmem>>, %arg6: memref<8x8xf32, #tpu.memory_space<vmem>>, %arg7: memref<16x16xf32, #tpu.memory_space<vmem>>, %arg8: memref<32x16xf32, #tpu.memory_space<vmem>>, %arg9: memref<2x2xf32, #tpu.memory_space<smem>>, %arg10: memref<2x2xf32, #tpu.memory_space<smem>>, %arg11: memref<1x16x32xf32, #tpu.memory_space<vmem>>) attributes {dimension_semantics = [#tpu.dimension_semantics<parallel>], iteration_bounds = array<i64: 2>, scalar_prefetch = 0 : i64, scratch_operands = 0 : i64, tpu.core_type = #tpu.core_type<tc>, window_params = [{transform_indices = @transform_0, window_bounds = array<i64: 1, 16, 32>}, {pipeline_mode = #tpu.pipeline_mode<synchronous>, transform_indices = @transform_1, window_bounds = array<i64: 8, 8, 32>}, {pipeline_mode = #tpu.pipeline_mode<synchronous>, transform_indices = @transform_2, window_bounds = array<i64: 4, 32, 8>}, {pipeline_mode = #tpu.pipeline_mode<synchronous>, transform_indices = @transform_3, window_bounds = array<i64: 32, 8>}, {pipeline_mode = #tpu.pipeline_mode<synchronous>, transform_indices = @transform_4, window_bounds = array<i64: 32, 8>}, {pipeline_mode = #tpu.pipeline_mode<synchronous>, transform_indices = @transform_5, window_bounds = array<i64: 8, 8>}, {pipeline_mode = #tpu.pipeline_mode<synchronous>, transform_indices = @transform_6, window_bounds = array<i64: 16, 16>}, {pipeline_mode = #tpu.pipeline_mode<synchronous>, transform_indices = @transform_7, window_bounds = array<i64: 32, 16>}, {transform_indices = @transform_8, window_bounds = array<i64: 2, 2>}, {transform_indices = @transform_9, window_bounds = array<i64: 2, 2>}, {transform_indices = @transform_10, window_bounds = array<i64: 1, 16, 32>}]} {
    %c0 = arith.constant 0 : index
    %c0_0 = arith.constant 0 : index
    %c0_1 = arith.constant 0 : index
    %0 = vector.load %arg1[%c0, %c0_0, %c0_1] : memref<1x16x32xf32, #tpu.memory_space<vmem>>, vector<1x16x32xf32>
    %1 = vector.shape_cast %0 : vector<1x16x32xf32> to vector<16x32xf32>
    %2 = arith.truncf %1 : vector<16x32xf32> to vector<16x32xbf16>
    %c0_2 = arith.constant 0 : index
    %c0_3 = arith.constant 0 : index
    %3 = vector.load %arg4[%c0_2, %c0_3] : memref<32x8xf32, #tpu.memory_space<vmem>>, vector<32x8xf32>
    %c0_4 = arith.constant 0 : index
    %c0_5 = arith.constant 0 : index
    %4 = vector.load %arg5[%c0_4, %c0_5] : memref<32x8xf32, #tpu.memory_space<vmem>>, vector<32x8xf32>
    %5 = vector.extract_strided_slice %3 {offsets = [0, 0], sizes = [16, 8], strides = [1, 1]} : vector<32x8xf32> to vector<16x8xf32>
    %6 = vector.extract_strided_slice %4 {offsets = [0, 0], sizes = [16, 8], strides = [1, 1]} : vector<32x8xf32> to vector<16x8xf32>
    %c0_6 = arith.constant 0 : index
    %c0_7 = arith.constant 0 : index
    %7 = vector.load %arg6[%c0_6, %c0_7] : memref<8x8xf32, #tpu.memory_space<vmem>>, vector<8x8xf32>
    %c0_8 = arith.constant 0 : index
    %c0_9 = arith.constant 0 : index
    %8 = vector.load %arg7[%c0_8, %c0_9] : memref<16x16xf32, #tpu.memory_space<vmem>>, vector<16x16xf32>
    %c0_10 = arith.constant 0 : index
    %c0_11 = arith.constant 0 : index
    %9 = vector.load %arg8[%c0_10, %c0_11] : memref<32x16xf32, #tpu.memory_space<vmem>>, vector<32x16xf32>
    %cst = arith.constant 0.000000e+00 : f32
    %10 = vector.broadcast %cst : f32 to vector<16x32xf32>
    %c4 = arith.constant 4 : index
    %c0_12 = arith.constant 0 : index
    %c0_13 = arith.constant 0 : index
    %11 = vector.load %arg2[%c4, %c0_12, %c0_13] : memref<8x8x32xbf16, #tpu.memory_space<vmem>>, vector<1x8x32xbf16>
    %12 = vector.shape_cast %11 : vector<1x8x32xbf16> to vector<8x32xbf16>
    %c6 = arith.constant 6 : index
    %c0_14 = arith.constant 0 : index
    %c0_15 = arith.constant 0 : index
    %13 = vector.load %arg2[%c6, %c0_14, %c0_15] : memref<8x8x32xbf16, #tpu.memory_space<vmem>>, vector<1x8x32xbf16>
    %14 = vector.shape_cast %13 : vector<1x8x32xbf16> to vector<8x32xbf16>
    %cst_16 = arith.constant dense<0.000000e+00> : vector<16x8xf32>
    %15 = tpu.matmul %2, %12, %cst_16 {dimension_numbers = #tpu.dot_dimension_numbers<[1], [1], [0], [0], [0, 0, 1, 0], [], []>} : vector<16x32xbf16>, vector<8x32xbf16>, vector<16x8xf32> -> vector<16x8xf32>
    %cst_17 = arith.constant dense<0.000000e+00> : vector<16x8xf32>
    %16 = tpu.matmul %2, %14, %cst_17 {dimension_numbers = #tpu.dot_dimension_numbers<[1], [1], [0], [0], [0, 0, 1, 0], [], []>} : vector<16x32xbf16>, vector<8x32xbf16>, vector<16x8xf32> -> vector<16x8xf32>
    %cst_18 = arith.constant dense<0.000000e+00> : vector<16x8xf32>
    %17 = tpu.matmul %8, %15, %cst_18 {dimension_numbers = #tpu.dot_dimension_numbers<[1], [0], [0], [1], [0, 0, 1, 1], [], []>} : vector<16x16xf32>, vector<16x8xf32>, vector<16x8xf32> -> vector<16x8xf32>
    %cst_19 = arith.constant dense<0.000000e+00> : vector<16x8xf32>
    %18 = tpu.matmul %8, %16, %cst_19 {dimension_numbers = #tpu.dot_dimension_numbers<[1], [0], [0], [1], [0, 0, 1, 1], [], []>} : vector<16x16xf32>, vector<16x8xf32>, vector<16x8xf32> -> vector<16x8xf32>
    %c0_20 = arith.constant 0 : index
    %c0_21 = arith.constant 0 : index
    %19 = memref.load %arg9[%c0_20, %c0_21] : memref<2x2xf32, #tpu.memory_space<smem>>
    %20 = vector.broadcast %19 : f32 to vector<16x8xf32>
    %21 = arith.mulf %20, %17 : vector<16x8xf32>
    %c0_22 = arith.constant 0 : index
    %c1 = arith.constant 1 : index
    %22 = memref.load %arg9[%c0_22, %c1] : memref<2x2xf32, #tpu.memory_space<smem>>
    %23 = vector.broadcast %22 : f32 to vector<16x8xf32>
    %24 = arith.mulf %23, %15 : vector<16x8xf32>
    %25 = arith.addf %21, %24 : vector<16x8xf32>
    %c0_23 = arith.constant 0 : index
    %c0_24 = arith.constant 0 : index
    %26 = memref.load %arg10[%c0_23, %c0_24] : memref<2x2xf32, #tpu.memory_space<smem>>
    %27 = vector.broadcast %26 : f32 to vector<16x8xf32>
    %28 = arith.mulf %27, %18 : vector<16x8xf32>
    %c0_25 = arith.constant 0 : index
    %c1_26 = arith.constant 1 : index
    %29 = memref.load %arg10[%c0_25, %c1_26] : memref<2x2xf32, #tpu.memory_space<smem>>
    %30 = vector.broadcast %29 : f32 to vector<16x8xf32>
    %31 = arith.mulf %30, %16 : vector<16x8xf32>
    %32 = arith.addf %28, %31 : vector<16x8xf32>
    %33 = arith.mulf %25, %5 : vector<16x8xf32>
    %cst_27 = arith.constant dense<0.000000e+00> : vector<16x8xf32>
    %34 = tpu.matmul %25, %7, %cst_27 {dimension_numbers = #tpu.dot_dimension_numbers<[1], [0], [0], [1], [0, 0, 1, 1], [], []>} : vector<16x8xf32>, vector<8x8xf32>, vector<16x8xf32> -> vector<16x8xf32>
    %35 = arith.mulf %34, %6 : vector<16x8xf32>
    %36 = arith.addf %33, %35 : vector<16x8xf32>
    %c0_28 = arith.constant 0 : index
    %c0_29 = arith.constant 0 : index
    %c0_30 = arith.constant 0 : index
    %37 = vector.load %arg2[%c0_28, %c0_29, %c0_30] : memref<8x8x32xbf16, #tpu.memory_space<vmem>>, vector<1x8x32xbf16>
    %38 = vector.shape_cast %37 : vector<1x8x32xbf16> to vector<8x32xbf16>
    %cst_31 = arith.constant dense<0.000000e+00> : vector<16x8xf32>
    %39 = tpu.matmul %2, %38, %cst_31 {dimension_numbers = #tpu.dot_dimension_numbers<[1], [1], [0], [0], [0, 0, 1, 0], [], []>} : vector<16x32xbf16>, vector<8x32xbf16>, vector<16x8xf32> -> vector<16x8xf32>
    %c1_32 = arith.constant 1 : index
    %c0_33 = arith.constant 0 : index
    %c0_34 = arith.constant 0 : index
    %40 = vector.load %arg2[%c1_32, %c0_33, %c0_34] : memref<8x8x32xbf16, #tpu.memory_space<vmem>>, vector<1x8x32xbf16>
    %41 = vector.shape_cast %40 : vector<1x8x32xbf16> to vector<8x32xbf16>
    %cst_35 = arith.constant dense<0.000000e+00> : vector<16x8xf32>
    %42 = tpu.matmul %2, %41, %cst_35 {dimension_numbers = #tpu.dot_dimension_numbers<[1], [1], [0], [0], [0, 0, 1, 0], [], []>} : vector<16x32xbf16>, vector<8x32xbf16>, vector<16x8xf32> -> vector<16x8xf32>
    %43 = tpu.concatenate %39, %42 in 0 : vector<16x8xf32>, vector<16x8xf32> -> vector<32x8xf32>
    %44 = arith.mulf %43, %3 : vector<32x8xf32>
    %cst_36 = arith.constant dense<0.000000e+00> : vector<32x8xf32>
    %45 = tpu.matmul %43, %7, %cst_36 {dimension_numbers = #tpu.dot_dimension_numbers<[1], [0], [0], [1], [0, 0, 1, 1], [], []>} : vector<32x8xf32>, vector<8x8xf32>, vector<32x8xf32> -> vector<32x8xf32>
    %46 = arith.mulf %45, %4 : vector<32x8xf32>
    %47 = arith.addf %44, %46 : vector<32x8xf32>
    %48 = arith.truncf %47 : vector<32x8xf32> to vector<32x8xbf16>
    %49 = arith.truncf %36 : vector<16x8xf32> to vector<16x8xbf16>
    %cst_37 = arith.constant dense<0.000000e+00> : vector<32x16xf32>
    %50 = tpu.matmul %48, %49, %cst_37 {dimension_numbers = #tpu.dot_dimension_numbers<[1], [1], [0], [0], [0, 0, 1, 0], [], []>} : vector<32x8xbf16>, vector<16x8xbf16>, vector<32x16xf32> -> vector<32x16xf32>
    %cst_38 = arith.constant 0.353553385 : f32
    %51 = vector.broadcast %cst_38 : f32 to vector<32x16xf32>
    %52 = arith.mulf %50, %51 : vector<32x16xf32>
    %53 = arith.addf %52, %9 : vector<32x16xf32>
    %cst_39 = arith.constant dense<0xFF800000> : vector<32xf32>
    %54 = vector.multi_reduction <maximumf>, %53, %cst_39 [1] : vector<32x16xf32> to vector<32xf32>
    %55 = vector.shape_cast %54 : vector<32xf32> to vector<32x1xf32>
    %56 = vector.broadcast %55 : vector<32x1xf32> to vector<32x16xf32>
    %57 = arith.subf %53, %56 : vector<32x16xf32>
    %58 = math.exp %57 : vector<32x16xf32>
    %cst_40 = arith.constant dense<0.000000e+00> : vector<32xf32>
    %59 = vector.multi_reduction <add>, %58, %cst_40 [1] : vector<32x16xf32> to vector<32xf32>
    %60 = vector.shape_cast %59 : vector<32xf32> to vector<32x1xf32>
    %61 = arith.truncf %58 : vector<32x16xf32> to vector<32x16xbf16>
    %62 = arith.truncf %32 : vector<16x8xf32> to vector<16x8xbf16>
    %cst_41 = arith.constant dense<0.000000e+00> : vector<32x8xf32>
    %63 = tpu.matmul %61, %62, %cst_41 {dimension_numbers = #tpu.dot_dimension_numbers<[1], [0], [0], [1], [0, 0, 1, 1], [], []>} : vector<32x16xbf16>, vector<16x8xbf16>, vector<32x8xf32> -> vector<32x8xf32>
    %64 = tpu.reciprocal %60 {approx = true} : vector<32x1xf32> -> vector<32x1xf32>
    %65 = vector.broadcast %64 : vector<32x1xf32> to vector<32x8xf32>
    %66 = arith.mulf %63, %65 : vector<32x8xf32>
    %67 = vector.extract_strided_slice %66 {offsets = [0, 0], sizes = [16, 8], strides = [1, 1]} : vector<32x8xf32> to vector<16x8xf32>
    %c0_42 = arith.constant 0 : index
    %c0_43 = arith.constant 0 : index
    %c0_44 = arith.constant 0 : index
    %68 = vector.load %arg3[%c0_42, %c0_43, %c0_44] : memref<4x32x8xbf16, #tpu.memory_space<vmem>>, vector<1x32x8xbf16>
    %69 = vector.shape_cast %68 : vector<1x32x8xbf16> to vector<32x8xbf16>
    %70 = arith.truncf %67 : vector<16x8xf32> to vector<16x8xbf16>
    %cst_45 = arith.constant dense<0.000000e+00> : vector<16x32xf32>
    %71 = tpu.matmul %70, %69, %cst_45 {dimension_numbers = #tpu.dot_dimension_numbers<[1], [1], [0], [0], [0, 0, 1, 0], [], []>} : vector<16x8xbf16>, vector<32x8xbf16>, vector<16x32xf32> -> vector<16x32xf32>
    %72 = arith.addf %10, %71 : vector<16x32xf32>
    %73 = vector.extract_strided_slice %66 {offsets = [16, 0], sizes = [16, 8], strides = [1, 1]} : vector<32x8xf32> to vector<16x8xf32>
    %c1_46 = arith.constant 1 : index
    %c0_47 = arith.constant 0 : index
    %c0_48 = arith.constant 0 : index
    %74 = vector.load %arg3[%c1_46, %c0_47, %c0_48] : memref<4x32x8xbf16, #tpu.memory_space<vmem>>, vector<1x32x8xbf16>
    %75 = vector.shape_cast %74 : vector<1x32x8xbf16> to vector<32x8xbf16>
    %76 = arith.truncf %73 : vector<16x8xf32> to vector<16x8xbf16>
    %cst_49 = arith.constant dense<0.000000e+00> : vector<16x32xf32>
    %77 = tpu.matmul %76, %75, %cst_49 {dimension_numbers = #tpu.dot_dimension_numbers<[1], [1], [0], [0], [0, 0, 1, 0], [], []>} : vector<16x8xbf16>, vector<32x8xbf16>, vector<16x32xf32> -> vector<16x32xf32>
    %78 = arith.addf %72, %77 : vector<16x32xf32>
    %c5 = arith.constant 5 : index
    %c0_50 = arith.constant 0 : index
    %c0_51 = arith.constant 0 : index
    %79 = vector.load %arg2[%c5, %c0_50, %c0_51] : memref<8x8x32xbf16, #tpu.memory_space<vmem>>, vector<1x8x32xbf16>
    %80 = vector.shape_cast %79 : vector<1x8x32xbf16> to vector<8x32xbf16>
    %c7 = arith.constant 7 : index
    %c0_52 = arith.constant 0 : index
    %c0_53 = arith.constant 0 : index
    %81 = vector.load %arg2[%c7, %c0_52, %c0_53] : memref<8x8x32xbf16, #tpu.memory_space<vmem>>, vector<1x8x32xbf16>
    %82 = vector.shape_cast %81 : vector<1x8x32xbf16> to vector<8x32xbf16>
    %cst_54 = arith.constant dense<0.000000e+00> : vector<16x8xf32>
    %83 = tpu.matmul %2, %80, %cst_54 {dimension_numbers = #tpu.dot_dimension_numbers<[1], [1], [0], [0], [0, 0, 1, 0], [], []>} : vector<16x32xbf16>, vector<8x32xbf16>, vector<16x8xf32> -> vector<16x8xf32>
    %cst_55 = arith.constant dense<0.000000e+00> : vector<16x8xf32>
    %84 = tpu.matmul %2, %82, %cst_55 {dimension_numbers = #tpu.dot_dimension_numbers<[1], [1], [0], [0], [0, 0, 1, 0], [], []>} : vector<16x32xbf16>, vector<8x32xbf16>, vector<16x8xf32> -> vector<16x8xf32>
    %cst_56 = arith.constant dense<0.000000e+00> : vector<16x8xf32>
    %85 = tpu.matmul %8, %83, %cst_56 {dimension_numbers = #tpu.dot_dimension_numbers<[1], [0], [0], [1], [0, 0, 1, 1], [], []>} : vector<16x16xf32>, vector<16x8xf32>, vector<16x8xf32> -> vector<16x8xf32>
    %cst_57 = arith.constant dense<0.000000e+00> : vector<16x8xf32>
    %86 = tpu.matmul %8, %84, %cst_57 {dimension_numbers = #tpu.dot_dimension_numbers<[1], [0], [0], [1], [0, 0, 1, 1], [], []>} : vector<16x16xf32>, vector<16x8xf32>, vector<16x8xf32> -> vector<16x8xf32>
    %c1_58 = arith.constant 1 : index
    %c0_59 = arith.constant 0 : index
    %87 = memref.load %arg9[%c1_58, %c0_59] : memref<2x2xf32, #tpu.memory_space<smem>>
    %88 = vector.broadcast %87 : f32 to vector<16x8xf32>
    %89 = arith.mulf %88, %85 : vector<16x8xf32>
    %c1_60 = arith.constant 1 : index
    %c1_61 = arith.constant 1 : index
    %90 = memref.load %arg9[%c1_60, %c1_61] : memref<2x2xf32, #tpu.memory_space<smem>>
    %91 = vector.broadcast %90 : f32 to vector<16x8xf32>
    %92 = arith.mulf %91, %83 : vector<16x8xf32>
    %93 = arith.addf %89, %92 : vector<16x8xf32>
    %c1_62 = arith.constant 1 : index
    %c0_63 = arith.constant 0 : index
    %94 = memref.load %arg10[%c1_62, %c0_63] : memref<2x2xf32, #tpu.memory_space<smem>>
    %95 = vector.broadcast %94 : f32 to vector<16x8xf32>
    %96 = arith.mulf %95, %86 : vector<16x8xf32>
    %c1_64 = arith.constant 1 : index
    %c1_65 = arith.constant 1 : index
    %97 = memref.load %arg10[%c1_64, %c1_65] : memref<2x2xf32, #tpu.memory_space<smem>>
    %98 = vector.broadcast %97 : f32 to vector<16x8xf32>
    %99 = arith.mulf %98, %84 : vector<16x8xf32>
    %100 = arith.addf %96, %99 : vector<16x8xf32>
    %101 = arith.mulf %93, %5 : vector<16x8xf32>
    %cst_66 = arith.constant dense<0.000000e+00> : vector<16x8xf32>
    %102 = tpu.matmul %93, %7, %cst_66 {dimension_numbers = #tpu.dot_dimension_numbers<[1], [0], [0], [1], [0, 0, 1, 1], [], []>} : vector<16x8xf32>, vector<8x8xf32>, vector<16x8xf32> -> vector<16x8xf32>
    %103 = arith.mulf %102, %6 : vector<16x8xf32>
    %104 = arith.addf %101, %103 : vector<16x8xf32>
    %c2 = arith.constant 2 : index
    %c0_67 = arith.constant 0 : index
    %c0_68 = arith.constant 0 : index
    %105 = vector.load %arg2[%c2, %c0_67, %c0_68] : memref<8x8x32xbf16, #tpu.memory_space<vmem>>, vector<1x8x32xbf16>
    %106 = vector.shape_cast %105 : vector<1x8x32xbf16> to vector<8x32xbf16>
    %cst_69 = arith.constant dense<0.000000e+00> : vector<16x8xf32>
    %107 = tpu.matmul %2, %106, %cst_69 {dimension_numbers = #tpu.dot_dimension_numbers<[1], [1], [0], [0], [0, 0, 1, 0], [], []>} : vector<16x32xbf16>, vector<8x32xbf16>, vector<16x8xf32> -> vector<16x8xf32>
    %c3 = arith.constant 3 : index
    %c0_70 = arith.constant 0 : index
    %c0_71 = arith.constant 0 : index
    %108 = vector.load %arg2[%c3, %c0_70, %c0_71] : memref<8x8x32xbf16, #tpu.memory_space<vmem>>, vector<1x8x32xbf16>
    %109 = vector.shape_cast %108 : vector<1x8x32xbf16> to vector<8x32xbf16>
    %cst_72 = arith.constant dense<0.000000e+00> : vector<16x8xf32>
    %110 = tpu.matmul %2, %109, %cst_72 {dimension_numbers = #tpu.dot_dimension_numbers<[1], [1], [0], [0], [0, 0, 1, 0], [], []>} : vector<16x32xbf16>, vector<8x32xbf16>, vector<16x8xf32> -> vector<16x8xf32>
    %111 = tpu.concatenate %107, %110 in 0 : vector<16x8xf32>, vector<16x8xf32> -> vector<32x8xf32>
    %112 = arith.mulf %111, %3 : vector<32x8xf32>
    %cst_73 = arith.constant dense<0.000000e+00> : vector<32x8xf32>
    %113 = tpu.matmul %111, %7, %cst_73 {dimension_numbers = #tpu.dot_dimension_numbers<[1], [0], [0], [1], [0, 0, 1, 1], [], []>} : vector<32x8xf32>, vector<8x8xf32>, vector<32x8xf32> -> vector<32x8xf32>
    %114 = arith.mulf %113, %4 : vector<32x8xf32>
    %115 = arith.addf %112, %114 : vector<32x8xf32>
    %116 = arith.truncf %115 : vector<32x8xf32> to vector<32x8xbf16>
    %117 = arith.truncf %104 : vector<16x8xf32> to vector<16x8xbf16>
    %cst_74 = arith.constant dense<0.000000e+00> : vector<32x16xf32>
    %118 = tpu.matmul %116, %117, %cst_74 {dimension_numbers = #tpu.dot_dimension_numbers<[1], [1], [0], [0], [0, 0, 1, 0], [], []>} : vector<32x8xbf16>, vector<16x8xbf16>, vector<32x16xf32> -> vector<32x16xf32>
    %cst_75 = arith.constant 0.353553385 : f32
    %119 = vector.broadcast %cst_75 : f32 to vector<32x16xf32>
    %120 = arith.mulf %118, %119 : vector<32x16xf32>
    %121 = arith.addf %120, %9 : vector<32x16xf32>
    %cst_76 = arith.constant dense<0xFF800000> : vector<32xf32>
    %122 = vector.multi_reduction <maximumf>, %121, %cst_76 [1] : vector<32x16xf32> to vector<32xf32>
    %123 = vector.shape_cast %122 : vector<32xf32> to vector<32x1xf32>
    %124 = vector.broadcast %123 : vector<32x1xf32> to vector<32x16xf32>
    %125 = arith.subf %121, %124 : vector<32x16xf32>
    %126 = math.exp %125 : vector<32x16xf32>
    %cst_77 = arith.constant dense<0.000000e+00> : vector<32xf32>
    %127 = vector.multi_reduction <add>, %126, %cst_77 [1] : vector<32x16xf32> to vector<32xf32>
    %128 = vector.shape_cast %127 : vector<32xf32> to vector<32x1xf32>
    %129 = arith.truncf %126 : vector<32x16xf32> to vector<32x16xbf16>
    %130 = arith.truncf %100 : vector<16x8xf32> to vector<16x8xbf16>
    %cst_78 = arith.constant dense<0.000000e+00> : vector<32x8xf32>
    %131 = tpu.matmul %129, %130, %cst_78 {dimension_numbers = #tpu.dot_dimension_numbers<[1], [0], [0], [1], [0, 0, 1, 1], [], []>} : vector<32x16xbf16>, vector<16x8xbf16>, vector<32x8xf32> -> vector<32x8xf32>
    %132 = tpu.reciprocal %128 {approx = true} : vector<32x1xf32> -> vector<32x1xf32>
    %133 = vector.broadcast %132 : vector<32x1xf32> to vector<32x8xf32>
    %134 = arith.mulf %131, %133 : vector<32x8xf32>
    %135 = vector.extract_strided_slice %134 {offsets = [0, 0], sizes = [16, 8], strides = [1, 1]} : vector<32x8xf32> to vector<16x8xf32>
    %c2_79 = arith.constant 2 : index
    %c0_80 = arith.constant 0 : index
    %c0_81 = arith.constant 0 : index
    %136 = vector.load %arg3[%c2_79, %c0_80, %c0_81] : memref<4x32x8xbf16, #tpu.memory_space<vmem>>, vector<1x32x8xbf16>
    %137 = vector.shape_cast %136 : vector<1x32x8xbf16> to vector<32x8xbf16>
    %138 = arith.truncf %135 : vector<16x8xf32> to vector<16x8xbf16>
    %cst_82 = arith.constant dense<0.000000e+00> : vector<16x32xf32>
    %139 = tpu.matmul %138, %137, %cst_82 {dimension_numbers = #tpu.dot_dimension_numbers<[1], [1], [0], [0], [0, 0, 1, 0], [], []>} : vector<16x8xbf16>, vector<32x8xbf16>, vector<16x32xf32> -> vector<16x32xf32>
    %140 = arith.addf %78, %139 : vector<16x32xf32>
    %141 = vector.extract_strided_slice %134 {offsets = [16, 0], sizes = [16, 8], strides = [1, 1]} : vector<32x8xf32> to vector<16x8xf32>
    %c3_83 = arith.constant 3 : index
    %c0_84 = arith.constant 0 : index
    %c0_85 = arith.constant 0 : index
    %142 = vector.load %arg3[%c3_83, %c0_84, %c0_85] : memref<4x32x8xbf16, #tpu.memory_space<vmem>>, vector<1x32x8xbf16>
    %143 = vector.shape_cast %142 : vector<1x32x8xbf16> to vector<32x8xbf16>
    %144 = arith.truncf %141 : vector<16x8xf32> to vector<16x8xbf16>
    %cst_86 = arith.constant dense<0.000000e+00> : vector<16x32xf32>
    %145 = tpu.matmul %144, %143, %cst_86 {dimension_numbers = #tpu.dot_dimension_numbers<[1], [1], [0], [0], [0, 0, 1, 0], [], []>} : vector<16x8xbf16>, vector<32x8xbf16>, vector<16x32xf32> -> vector<16x32xf32>
    %146 = arith.addf %140, %145 : vector<16x32xf32>
    %c0_87 = arith.constant 0 : index
    %c0_88 = arith.constant 0 : index
    %c0_89 = arith.constant 0 : index
    %147 = vector.load %arg11[%c0_87, %c0_88, %c0_89] : memref<1x16x32xf32, #tpu.memory_space<vmem>>, vector<1x16x32xf32>
    %148 = vector.shape_cast %147 : vector<1x16x32xf32> to vector<16x32xf32>
    %149 = vector.shape_cast %146 : vector<16x32xf32> to vector<1x16x32xf32>
    tpu.vector_store %arg11[%c0_87, %c0_88, %c0_89], %149 {strides = array<i32>} : memref<1x16x32xf32, #tpu.memory_space<vmem>>, vector<1x16x32xf32>,
    return
  }
  func.func @transform_0(%arg0: i32) -> (i32, i32, i32) {
    %c0_i32 = arith.constant 0 : i32
    %c0_i32_0 = arith.constant 0 : i32
    %c0_i32_1 = arith.constant 0 : i32
    return %arg0, %c0_i32, %c0_i32_0 : i32, i32, i32
  }
  func.func @transform_1(%arg0: i32) -> (i32, i32, i32) {
    %c0_i32 = arith.constant 0 : i32
    %c0_i32_0 = arith.constant 0 : i32
    %c0_i32_1 = arith.constant 0 : i32
    %c0_i32_2 = arith.constant 0 : i32
    return %c0_i32, %c0_i32_0, %c0_i32_1 : i32, i32, i32
  }
  func.func @transform_2(%arg0: i32) -> (i32, i32, i32) {
    %c0_i32 = arith.constant 0 : i32
    %c0_i32_0 = arith.constant 0 : i32
    %c0_i32_1 = arith.constant 0 : i32
    %c0_i32_2 = arith.constant 0 : i32
    return %c0_i32, %c0_i32_0, %c0_i32_1 : i32, i32, i32
  }
  func.func @transform_3(%arg0: i32) -> (i32, i32) {
    %c0_i32 = arith.constant 0 : i32
    %c0_i32_0 = arith.constant 0 : i32
    %c0_i32_1 = arith.constant 0 : i32
    return %c0_i32, %c0_i32_0 : i32, i32
  }
  func.func @transform_4(%arg0: i32) -> (i32, i32) {
    %c0_i32 = arith.constant 0 : i32
    %c0_i32_0 = arith.constant 0 : i32
    %c0_i32_1 = arith.constant 0 : i32
    return %c0_i32, %c0_i32_0 : i32, i32
  }
  func.func @transform_5(%arg0: i32) -> (i32, i32) {
    %c0_i32 = arith.constant 0 : i32
    %c0_i32_0 = arith.constant 0 : i32
    %c0_i32_1 = arith.constant 0 : i32
    return %c0_i32, %c0_i32_0 : i32, i32
  }
  func.func @transform_6(%arg0: i32) -> (i32, i32) {
    %c0_i32 = arith.constant 0 : i32
    %c0_i32_0 = arith.constant 0 : i32
    %c0_i32_1 = arith.constant 0 : i32
    return %c0_i32, %c0_i32_0 : i32, i32
  }
  func.func @transform_7(%arg0: i32) -> (i32, i32) {
    %c0_i32 = arith.constant 0 : i32
    %c0_i32_0 = arith.constant 0 : i32
    %c0_i32_1 = arith.constant 0 : i32
    return %c0_i32, %c0_i32_0 : i32, i32
  }
  func.func @transform_8(%arg0: i32) -> (i32, i32) {
    %c0_i32 = arith.constant 0 : i32
    %c0_i32_0 = arith.constant 0 : i32
    %c0_i32_1 = arith.constant 0 : i32
    return %c0_i32, %c0_i32_0 : i32, i32
  }
  func.func @transform_9(%arg0: i32) -> (i32, i32) {
    %c0_i32 = arith.constant 0 : i32
    %c0_i32_0 = arith.constant 0 : i32
    %c0_i32_1 = arith.constant 0 : i32
    return %c0_i32, %c0_i32_0 : i32, i32
  }
  func.func @transform_10(%arg0: i32) -> (i32, i32, i32) {
    %c0_i32 = arith.constant 0 : i32
    %c0_i32_0 = arith.constant 0 : i32
    %c0_i32_1 = arith.constant 0 : i32
    return %arg0, %c0_i32, %c0_i32_0 : i32, i32, i32
  }
}

</mosaic_0001>

<bundles_post_ra>
// kernel: baichuan_flash_attention2_forward.1
= control target key start
LH: loop header
LB: loop body
LE: loop exit
PB: predicated region body
PF: predicated region fallthrough
CT: control target
= control target key end

     0   :  { %15 = vsyncpa [#allocation4], 0  ;;  %s3255_s0 = inlined_call_operand.vmem [shape: f32[2,16,32], index: 0, kind: input, shape index: {}]   ;;  %s3256_s1 = inlined_call_operand.vmem [shape: bf16[8,8,32], index: 1, kind: input, shape index: {}]   ;;  %s3257_s2 = inlined_call_operand.vmem [shape: bf16[4,32,8], index: 2, kind: input, shape index: {}]   ;;  %s3258_s3 = inlined_call_operand.vmem [shape: f32[32,8], index: 3, kind: input, shape index: {}]   ;;  %s3259_s4 = inlined_call_operand.vmem [shape: f32[32,8], index: 4, kind: input, shape index: {}]   ;;  %s3260_s5 = inlined_call_operand.vmem [shape: f32[8,8], index: 5, kind: input, shape index: {}]   ;;  %s3261_s6 = inlined_call_operand.vmem [shape: f32[16,16], index: 6, kind: input, shape index: {}]   ;;  %s3262_s7 = inlined_call_operand.vmem [shape: f32[32,16], index: 7, kind: input, shape index: {}]   ;;  %s3263_s8 = inlined_call_operand.vmem [shape: f32[2,2], index: 8, kind: input, shape index: {}]   ;;  %s3264_s9 = inlined_call_operand.vmem [shape: f32[2,2], index: 9, kind: input, shape index: {}]   ;;  %s3265_s10 = inlined_call_operand.hbm [shape: f32[2,16,32], index: 10, kind: output, shape index: {}]  }
   0x1   :  { %16 = vsyncpa [#allocation6], 0 }
   0x2   :  { %17 = vsyncpa [#allocation3], 0 }
   0x3   :  { %19 = vsyncpa [#allocation3 + $0x1], 0  ;;  %s2813_s13 = smov 0   ;;  %s2815_s14 = smov 0  }
   0x4   :  { %s2817_s15 = smov 0   ;;  %s2819_s16 = smov 0  }
   0x5 LB: > { %s2834_s17 = sadd.s32 4294967295, %s2749_s16   ;;  %s2224_s18 = sadd.s32 4294967294, %s2749_s16   ;;  %s2749_s16 = sphi %s2819_s16, %s3283_s16   ;;  %s2745_s15 = sphi %s2817_s15, %s3282_s15   ;;  %s2741_s14 = sphi %s2815_s14, %s3281_s14   ;;  %s2737_s13 = sphi %s2813_s13, %s3280_s13  }
   0x6   : > { %s2838_s19 = sadd.s32 1, %s2749_s16   ;;  %s247_s20 = sadd.s32 1, %s2745_s15 }
   0x7   : > { %s244_s21 = ssub.s32 %s2749_s16, %s2838_s19  ;;  %p257_p0 = scmp.ne.s32.totalorder %s2745_s15, %s2741_s14 }
   0x8   : > { %p245_p1 = scmp.eq.s32.totalorder %s244_s21, 0  ;;  %p258_p2 = scmp.eq.s32.totalorder %s2834_s17, 1 }
   0x9   : > { %p263_p3 = scmp.ne.s32.totalorder %s2741_s14, %s2737_s13  ;;  %p264_p4 = scmp.eq.s32.totalorder %s2224_s18, 1 }
   0xa   : > { %s2849_s22 = scalar_select %p245_p1, %s2745_s15, %s247_s20  }
   0xb   : > { %p2851_p5 = por %p258_p2, %p257_p0  ;;  %p2855_p6 = por %p264_p4, %p263_p3 }
   0xc   : > { %p2225_p7 = scmp.ge.s32.totalorder %s2749_s16, 1  ;;  %p271_p8 = scmp.lt.s32.totalorder %s2749_s16, 3 }
   0xd   : > { %s3269_s23 = scalar_select %p2851_p5, 1, 0 }
   0xe   : > { %s3270_s24 = scalar_select %p2855_p6, 1, 0 }
   0xf   : > { %p3266_p9 = scmp.eq.s32.totalorder %s2834_s17, 0  ;;  %p2862_p10 = pnand %p2225_p7, %p271_p8 }
  0x10   : > { %s305_s28 = sshll.u32 %s3263_s8, 4  ;;  %s316_s11 = sshll.u32 %s3264_s9, 4  ;;  %s306_s28 = int_to_ptr.vmem [resolvable:$true] %s305_s28  ;;  %s317_s11 = int_to_ptr.vmem [resolvable:$true] %s316_s11 }
  0x11   : > { %s3271_s25 = scalar_select %p2862_p10, 1, 0 }
  0x12   : > { %p2557_p11 = pneg %p2862_p10  ;;  %s2651_s18 = scalar_lea.vmem %s306_s28, 32 }
  0x13   : > { %p2652_p13 = scmp.ne.s32.totalorder %s306_s28, %s2651_s18  ;;  %p2659_p3 = scmp.lt.s32.totalorder %s306_s28, %s306_s28 }
  0x14   : > { %p2876_p12 = pnand %p3266_p9, %p2557_p11  ;;  %p2660_p4 = scmp.lt.s32.totalorder %s2651_s18, %s2651_s18 }
  0x16   : > { %p2653_p0 = pneg %p2876_p12  ;;  %p2661_p7 = por %p2660_p4, %p2659_p3 }
  0x18   : > { %p2654_p1 = pnand %p2653_p0, %p2652_p13 }
  0x1a   : > { %p2655_p2 = pneg %p2654_p1 }
  0x1c   : > { %p2662_p8 = pnand %p2661_p7, %p2655_p2 }
  0x1e   : > { %2665 = shalt.err (!%p2662_p8)
}
  0x1f   : > { %s2751_s20 = smov [#allocation2]   ;;  %s2666_s21 = scalar_lea.vmem %s317_s11, 32 }
  0x20   : > { %2560 = dma.vmem_to_smem (!%p2876_p12), %s306_s28, 32, %s2751_s20, [#allocation4]  }
  0x21   : > { %p2667_p11 = scmp.ne.s32.totalorder %s317_s11, %s2666_s21  ;;  %p2674_p5 = scmp.lt.s32.totalorder %s317_s11, %s317_s11 }
  0x22   : > { %p2675_p10 = scmp.lt.s32.totalorder %s2666_s21, %s2666_s21 }
  0x23   : > { %p2669_p9 = pnand %p2667_p11, %p2653_p0 }
  0x24   : > { %p2676_p13 = por %p2675_p10, %p2674_p5 }
  0x25   : > { %p2670_p6 = pneg %p2669_p9 }
  0x27   : > { %p2677_p1 = pnand %p2676_p13, %p2670_p6 }
  0x29   : > { %2680 = shalt.err (!%p2677_p1)
}
  0x2a   : > { %s2752_s26 = smov [#allocation5]   ;;  %p3273_p2 = scmp.ne.s32.totalorder %s3271_s25, 0 }
  0x2b   : > { %2563 = dma.vmem_to_smem (!%p2876_p12), %s317_s11, 32, %s2752_s26, [#allocation6]  }
  0x2c   : > { %337 = sbr.rel (%p3273_p2) target bundleno = 3036 (0xbdc), region = 60  ;;  %p3274_p3 = scmp.eq.s32.totalorder (!%p3273_p2), %s2834_s17, 0 }
  0x31   : > { %2724 = dma.done.wait (%p3274_p3), [#allocation4], 32   ;;  %p3275_p4 = pmov %p3274_p3 }
  0x32   : > { %p3276_p9 = pmov %p3274_p3 }
  0x33   : > { %2726 = vsyncadd (%p3275_p4), [#allocation4], 4294967264 }
  0x34   : > { %2728 = dma.done.wait (%p3276_p9), [#allocation6], 32   ;;  %p3277_p5 = pmov %p3274_p3 }
  0x36   : > { %2730 = vsyncadd (%p3277_p5), [#allocation6], 4294967264 }
  0x37   : > { %347 = sfence }
  0x38   : > { %v2235_v0 = vld [vmem:[%s3256_s1 + $0x10] sm:$0xf]  ;;  %vm408_vm0 = vcmask 261120   ;;  %v2236_v1 = vld [vmem:[%s3256_s1 + $0x18] sm:$0xf]  ;;  %v2753_v2 = vmov 0.0  }
  0x39   : > { %2387 = vmatprep.subr.bf16.mxu0 %v2753_v2  ;;  %v413_v3 = vsel %vm408_vm0, %v2235_v0, 0  ;;  %2393 = vmatprep.subr.bf16.mxu1 %v2753_v2  ;;  %v457_v4 = vsel %vm408_vm0, %v2236_v1, 0  ;;  %p380_p6 = scmp.lt.s32.totalorder %s2834_s17, 1  ;;  %vm2754_vm1 = vmmov 0   ;;  %v2924_v8 = vld [vmem:[%s3261_s6] sm:$0xff]  ;;  %vm500_vm2 = vcmask 130048  }
  0x3a   : > { %2388 = vmatpush3.bf16.xpose.msra.mxu0 %v413_v3  ;;  %2394 = vmatpush3.bf16.xpose.msra.mxu1 %v457_v4  ;;  %v2931_v16 = vld [vmem:[%s3261_s6 + $0x8] sm:$0xff]  ;;  %v765_v18 = vld [vmem:[%s3256_s1] sm:$0xf]  ;;  %s657_s12 = sld [smem:[#allocation2]]  ;;  %v2248_v29 = vld [vmem:[%s3256_s1 + $0x4] sm:$0xf] }
  0x3b   : > { %2389 = vmatprep.mubr.msk.bf16.mxu0 %vm2754_vm1, %v2753_v2  ;;  %s381_s30 = scalar_select %p380_p6, %s2834_s17, 1  ;;  %2395 = vmatprep.mubr.msk.bf16.mxu1 %vm2754_vm1, %v2753_v2  ;;  %v767_v19 = vsel %vm408_vm0, %v765_v18, 0  ;;  %v2951_v20 = vld [vmem:[%s3260_s5] sm:$0xff]  ;;  %vm679_vm3 = vcmask 64512   ;;  %v813_v37 = vsel %vm408_vm0, %v2248_v29, 0  ;;  %v2974_v48 = vld [vmem:[%s3259_s4 + $0x8] sm:$0xff] }
  0x3c   : > { %2413 = vmatprep.subr.mxu0 %v2951_v20  ;;  %s2243_s18 = sld [smem:[#allocation2 + $0x1]]  ;;  %v2979_v49 = vld [vmem:[%s3258_s3] sm:$0xff]  ;;  %v2984_v50 = vld [vmem:[%s3258_s3 + $0x8] sm:$0xff]  ;;  %s2314_s25 = sshll.u32 %s2834_s17, 8 }
  0x3d   : > { %s2313_s11 = sshll.u32 %s381_s30, 4  ;;  %s2244_s21 = sld [smem:[#allocation5 + $0x1]]  ;;  %v2989_v52 = vld [vmem:[%s3259_s4] sm:$0xff] }
  0x3e   : > { %s384_s20 = scalar_lea.vmem %s3255_s0, %s2313_s11  ;;  %s3210_s11 = scalar_lea.hbm %s3265_s10, %s2314_s25 }
  0x3f   : > { %v386_v5 = vld [vmem:[%s384_s20] sm:$0xff]  ;;  %v387_v6 = vld [vmem:[%s384_s20 + $0x8] sm:$0xff]  ;;  %s667_s20 = sld [smem:[#allocation5]]  ;;  %p3278_p12 = scmp.ne.s32.totalorder %s3269_s23, 0 }
  0x40   : > { %v2915_v7 = vpack.c.bf16 %v387_v6, %v386_v5  ;;  %v658_v21 = vstv %s657_s12  ;;  %s2276_s12 = sld [smem:[#allocation2 + $0x80]] }
  0x42   : > { %2390 = vmatmul.mubr.msk.bf16.vlgmr.msra.gmra.mxu0 %vm408_vm0, %v2915_v7  ;;  %2396 = vmatmul.mubr.msk.bf16.vlgmr.msra.gmra.mxu1 %vm408_vm0, %v2915_v7  ;;  %v662_v22 = vstv %s2243_s18  ;;  %s2277_s18 = sld [smem:[#allocation2 + $0x81]] }
  0x43   : > { %2403 = vmatprep.mubr.msk.f32.mxu1 %vm500_vm2, %v2924_v8  ;;  %2414 = vmatpush3.msra.mxu0 %v2951_v20  ;;  %v672_v31 = vstv %s2244_s21  ;;  %s2279_s21 = sld [smem:[#allocation5 + $0x81]] }
  0x44   : > { %2424 = vmatprep.subr.bf16.mxu0 %v2753_v2 }
  0x45   : > { %v668_v26 = vstv %s667_s20  ;;  %s2278_s20 = sld [smem:[#allocation5 + $0x80]] }
 0x102   : > { %v449_v9 = vpop.f32.mrf.mxu0  ;;  %v493_v10 = vpop.f32.mrf.mxu1 }
 0x103   : > { %v663_v27 = vmul.f32 %v662_v22, %v449_v9  ;;  %v673_v38 = vmul.f32 %v672_v31, %v493_v10 }
 0x104   : > { %v2391_v11 = vpop.f32.mrf.mxu0  ;;  %v2397_v12 = vpop.f32.mrf.mxu1 }
 0x106   : > { %v452_v13 = vpop.f32.mrf.mxu0  ;;  %v496_v14 = vpop.f32.mrf.mxu1 }
 0x107   : > { %2399 = vmatprep.subr.mxu1 %v452_v13  ;;  %v664_v30 = vmul.f32 %v662_v22, %v452_v13  ;;  %v674_v39 = vmul.f32 %v672_v31, %v496_v14 }
 0x108   : > { %v2392_v15 = vpop.f32.mrf.mxu0  ;;  %2400 = vmatpush3.msra.mxu1 %v452_v13  ;;  %v2398_v17 = vpop.f32.mrf.mxu1 }
 0x109   : > { %2401 = vmatprep.subr.mxu1 %v449_v9  ;;  %v3013_v15 = vld [vmem:[%s3258_s3 + $0x10] sm:$0xff]  ;;  %v3018_v17 = vld [vmem:[%s3258_s3 + $0x18] sm:$0xff] }
 0x10a   : > { %2402 = vmatpush3.msra.mxu1 %v449_v9 }
 0x10b   : > { %2404 = vmatmul.mubr.msk.f32.vlgmr.msra.gmra.mxu1 %vm500_vm2, %v2931_v16  ;;  %2406 = vmatprep.subr.mxu1 %v496_v14 }
 0x10c   : > { %2407 = vmatpush3.msra.mxu1 %v496_v14  ;;  %2410 = vmatprep.mubr.msk.f32.mxu1 %vm500_vm2, %v2924_v8  ;;  %v3008_v14 = vld [vmem:[%s3259_s4 + $0x18] sm:$0xff] }
 0x10d   : > { %2408 = vmatprep.subr.mxu1 %v493_v10 }
 0x10e   : > { %2409 = vmatpush3.msra.mxu1 %v493_v10 }
 0x10f   : > { %2411 = vmatmul.mubr.msk.f32.vlgmr.msra.gmra.mxu1 %vm500_vm2, %v2931_v16  ;;  %2418 = vmatprep.subr.bf16.mxu1 %v2753_v2 }
 0x110   : > { %2419 = vmatpush3.bf16.xpose.msra.mxu1 %v767_v19  ;;  %2420 = vmatprep.mubr.msk.bf16.mxu1 %vm2754_vm1, %v2753_v2  ;;  %v3023_v19 = vld [vmem:[%s3259_s4 + $0x10] sm:$0xff] }
 0x111   : > { %2430 = vmatprep.subr.mxu1 %v2951_v20 }
 0x117   : > { %2421 = vmatmul.mubr.msk.bf16.vlgmr.msra.gmra.mxu1 %vm408_vm0, %v2915_v7 }
 0x118   : > { %2431 = vmatpush3.msra.mxu1 %v2951_v20 }
 0x1cb   : > { %v2405_v23 = vpop.f32.mrf.mxu1 }
 0x1cc   : > { %v660_v24 = vmul.f32 %v2405_v23, %v658_v21 }
 0x1cd   : > { %v573_v25 = vpop.f32.mrf.mxu1 }
 0x1ce   : > { %v659_v28 = vmul.f32 %v658_v21, %v573_v25  ;;  %v666_v35 = vadd.f32 %v664_v30, %v660_v24  ;;  %v3035_v30 = vld [vmem:[%s3262_s7 + $0x10] sm:$0xff] }
 0x1cf   : > { %v2412_v32 = vpop.f32.mrf.mxu1 }
 0x1d0   : > { %v665_v33 = vadd.f32 %v663_v27, %v659_v28  ;;  %v670_v34 = vmul.f32 %v2412_v32, %v668_v26  ;;  %v678_v55 = vmul.f32 %v666_v35, %v2984_v50 }
 0x1d1   : > { %v648_v36 = vpop.f32.mrf.mxu1 }
 0x1d2   : > { %v669_v40 = vmul.f32 %v668_v26, %v648_v36  ;;  %2415 = vmatprep.mubr.msk.f32.mxu0 %vm679_vm3, %v665_v33  ;;  %v676_v41 = vadd.f32 %v674_v39, %v670_v34  ;;  %v677_v56 = vmul.f32 %v665_v33, %v2979_v49  ;;  %v3040_v33 = vld [vmem:[%s3262_s7] sm:$0xff] }
 0x1d3   : > { %2416 = vmatmul.mubr.msk.f32.vlgmr.msra.gmra.mxu0 %vm679_vm3, %v666_v35 }
 0x1d4   : > { %v675_v42 = vadd.f32 %v673_v38, %v669_v40  ;;  %2425 = vmatpush3.bf16.xpose.msra.mxu0 %v813_v37  ;;  %2426 = vmatprep.mubr.msk.bf16.mxu0 %vm2754_vm1, %v2753_v2  ;;  %v3046_v37 = vld [vmem:[%s3262_s7 + $0x18] sm:$0xff] }
 0x1d6   : > { %v1072_v43 = vpack.c.bf16 %v676_v41, %v675_v42  ;;  %v3053_v42 = vld [vmem:[%s3262_s7 + $0x8] sm:$0xff] }
 0x1d7   : > { %v803_v44 = vpop.f32.mrf.mxu1 }
 0x1d8   : > { %2444 = vmatprep.subr.bf16.mxu1 %v1072_v43  ;;  %2432 = vmatprep.mubr.msk.f32.mxu1 %vm679_vm3, %v803_v44  ;;  %v856_v4 = vmul.f32 %v803_v44, %v2979_v49 }
 0x1d9   : > { %v2422_v45 = vpop.f32.mrf.mxu1 }
 0x1db   : > { %2427 = vmatmul.mubr.msk.bf16.vlgmr.msra.gmra.mxu0 %vm408_vm0, %v2915_v7  ;;  %v806_v46 = vpop.f32.mrf.mxu1 }
 0x1dc   : > { %2433 = vmatmul.mubr.msk.f32.vlgmr.msra.gmra.mxu1 %vm679_vm3, %v806_v46  ;;  %v857_v5 = vmul.f32 %v806_v46, %v2984_v50 }
 0x1dd   : > { %2445 = vmatpush3.bf16.msra.mxu1 %v1072_v43  ;;  %v2423_v47 = vpop.f32.mrf.mxu1 }
 0x1de   : > { %2458 = vmatprep.subr.bf16.mxu1 %v2753_v2 }
 0x293   : > { %v2417_v51 = vpop.f32.mrf.mxu0 }
 0x294   : > { %v762_v53 = vmul.f32 %v2417_v51, %v2974_v48 }
 0x295   : > { %v752_v54 = vpop.f32.mrf.mxu0 }
 0x296   : > { %v761_v57 = vmul.f32 %v752_v54, %v2989_v52  ;;  %v764_v58 = vadd.f32 %v762_v53, %v678_v55 }
 0x298   : > { %v763_v59 = vadd.f32 %v761_v57, %v677_v56 }
 0x29a   : > { %v967_v60 = vpack.c.bf16 %v764_v58, %v763_v59 }
 0x29b   : > { %v849_v61 = vpop.f32.mrf.mxu0 }
 0x29c   : > { %2435 = vmatprep.mubr.msk.f32.mxu1 %vm679_vm3, %v849_v61  ;;  %v2434_v62 = vpop.f32.mrf.mxu1  ;;  %2545 = vmatprep.subr.msk.bf16.mxu0 %vm679_vm3, %v967_v60  ;;  %v975_v63 = vsel %vm679_vm3, %v967_v60, 0  ;;  %v858_v23 = vmul.f32 %v849_v61, %v3013_v15 }
 0x29d   : > { %v2428_v0 = vpop.f32.mrf.mxu0  ;;  %v958_v1 = vmul.f32 %v2434_v62, %v2974_v48  ;;  %2439 = vmatpush3.bf16.xpose.msra.mxu0 %v975_v63 }
 0x29e   : > { %v938_v3 = vpop.f32.mrf.mxu1  ;;  %2450 = vmatprep.subr.bf16.mxu0 %v2753_v2 }
 0x29f   : > { %v852_v6 = vpop.f32.mrf.mxu0  ;;  %v957_v9 = vmul.f32 %v938_v3, %v2989_v52  ;;  %v962_v10 = vadd.f32 %v958_v1, %v857_v5 }
 0x2a0   : > { %2436 = vmatmul.mubr.msk.f32.gmra.mxu1 %vm679_vm3, %v852_v6  ;;  %v859_v24 = vmul.f32 %v852_v6, %v3018_v17 }
 0x2a1   : > { %v961_v11 = vadd.f32 %v957_v9, %v856_v4  ;;  %v2429_v12 = vpop.f32.mrf.mxu0 }
 0x2a3   : > { %v965_v13 = vpack.c.bf16 %v962_v10, %v961_v11 }
 0x2a5   : > { %2440 = vmatprep.mubr.msk.bf16.mxu0 %vm679_vm3, %v965_v13 }
 0x360   : > { %v2437_v18 = vpop.f32.mrf.mxu1 }
 0x361   : > { %v960_v21 = vmul.f32 %v2437_v18, %v3008_v14  ;;  %v2611_v18 = vld [vmem:[%s3257_s2 + $0x18] sm:$0xff]  }
 0x362   : > { %v948_v22 = vpop.f32.mrf.mxu1 }
 0x363   : > { %v959_v25 = vmul.f32 %v948_v22, %v3023_v19  ;;  %v964_v26 = vadd.f32 %v960_v21, %v859_v24  ;;  %v2612_v21 = vld [vmem:[%s3257_s2 + $0x8] sm:$0xff]   ;;  %v1164_v22 = vsel %vm679_vm3, %v2611_v18, 0  ;;  %v2613_v24 = vld [vmem:[%s3257_s2 + $0x10] sm:$0xff]  }
 0x364   : > { %v2282_v18 = vld [vmem:[%s3256_s1 + $0x8] sm:$0xf] }
 0x365   : > { %v963_v27 = vadd.f32 %v959_v25, %v858_v23  ;;  %v1224_v23 = vsel %vm679_vm3, %v2612_v21, 0  ;;  %v1161_v25 = vsel %vm679_vm3, %v2613_v24, 0 }
 0x367   : > { %v966_v28 = vpack.c.bf16 %v964_v26, %v963_v27  ;;  %v2614_v26 = vld [vmem:[%s3257_s2] sm:$0xff]  }
 0x368   : > { %v1221_v27 = vsel %vm679_vm3, %v2614_v26, 0  ;;  %v1520_v26 = vstv %s2278_s20 }
 0x369   : > { %2441 = vmatmul.mubr.msk.bf16.vlgmr.msra.gmra.mxu0 %vm679_vm3, %v966_v28 }
 0x36a   : > { %2454 = vmatprep.mubr.msk.bf16.mxu0 %vm2754_vm1, %v2753_v2  ;;  %2451 = vmatpush3.bf16.xpose.msra.mxu0 %v1164_v22  ;;  %v1619_v22 = vsel %vm408_vm0, %v2282_v18, 0 }
 0x36b   : > { %2452 = vmatprep.subr.bf16.mxu0 %v2753_v2 }
 0x372   : > { %2453 = vmatpush3.bf16.xpose.msra.mxu0 %v1161_v25 }
 0x373   : > { %2466 = vmatprep.subr.bf16.mxu0 %v2753_v2 }
 0x429   : > { %v2442_v29 = vpop.f32.mrf.mxu0 }
 0x42a   : > { %v1028_v31 = vmul.f32 0.35355338, %v2442_v29 }
 0x42b   : > { %v1011_v32 = vpop.f32.mrf.mxu0 }
 0x42c   : > { %v1026_v34 = vmul.f32 0.35355338, %v1011_v32  ;;  %v1032_v35 = vadd.f32 %v1028_v31, %v3035_v30 }
 0x42d   : > { %v2443_v36 = vpop.f32.mrf.mxu0 }
 0x42e   : > { %v1029_v38 = vmul.f32 0.35355338, %v2443_v36  ;;  %v1040_v39 = vsel %vm500_vm2, %v1032_v35, -inf  ;;  %v1030_v40 = vadd.f32 %v1026_v34, %v3040_v33 }
 0x42f   : > { %1041 = vmax.xlane.f32.xlu1 %v1040_v39  ;;  %v1014_v41 = vpop.f32.mrf.mxu0 }
 0x430   : > { %v1027_v43 = vmul.f32 0.35355338, %v1014_v41  ;;  %v1034_v44 = vsel %vm500_vm2, %v1030_v40, -inf  ;;  %v1033_v45 = vadd.f32 %v1029_v38, %v3046_v37 }
 0x431   : > { %1035 = vmax.xlane.f32.xlu0 %v1034_v44 }
 0x432   : > { %v1043_v46 = vsel %vm500_vm2, %v1033_v45, -inf  ;;  %v1031_v47 = vadd.f32 %v1027_v43, %v3053_v42 }
 0x433   : > { %1044 = vmax.xlane.f32.xlu1 %v1043_v46 }
 0x434   : > { %v1037_v51 = vsel %vm500_vm2, %v1031_v47, -inf }
 0x435   : > { %1038 = vmax.xlane.f32.xlu0 %v1037_v51 }
 0x4b8   : > { %v1042_v53 = vpop.xlane.xlu1 %1041 }
 0x4b9   : > { %v1048_v54 = vsub.f32 %v1032_v35, %v1042_v53 }
 0x4ba   : > { %v1036_v55 = vpop.xlane.xlu0 %1035 }
 0x4bb   : > { %v1054_v56 = vmul.f32 1.442695, %v1048_v54  ;;  %v1046_v57 = vsub.f32 %v1030_v40, %v1036_v55  ;;  %v2268_v40 = vld [vmem:[%s3256_s1 + $0x14] sm:$0xf] }
 0x4bc   : > { %v1045_v58 = vpop.xlane.xlu1 %1044  ;;  %v1272_v55 = vsel %vm408_vm0, %v2268_v40, 0 }
 0x4bd   : > { %2619 = vpow2.f32 %v1054_v56  ;;  %v1050_v59 = vmul.f32 1.442695, %v1046_v57  ;;  %v1049_v60 = vsub.f32 %v1033_v45, %v1045_v58 }
 0x4be   : > { %v1039_v61 = vpop.xlane.xlu0 %1038 }
 0x4bf   : > { %2621 = vpow2.f32 %v1050_v59  ;;  %v1056_v62 = vmul.f32 1.442695, %v1049_v60  ;;  %v1047_v63 = vsub.f32 %v1031_v47, %v1039_v61  ;;  %v2269_v47 = vld [vmem:[%s3256_s1 + $0x1c] sm:$0xf] }
 0x4c0   : > { %v1316_v57 = vsel %vm408_vm0, %v2269_v47, 0 }
 0x4c1   : > { %2623 = vpow2.f32 %v1056_v62  ;;  %v1052_v0 = vmul.f32 1.442695, %v1047_v63 }
 0x4c3   : > { %2625 = vpow2.f32 %v1052_v0 }
 0x4ca   : > { %v2620_v1 = vpop.eup %2619 }
 0x4cb   : > { %v1064_v3 = vsel %vm500_vm2, %v2620_v1, 0.0 }
 0x4cc   : > { %v2622_v4 = vpop.eup %2621  ;;  %1065 = vadd.xlane.f32.xlu0 %v1064_v3 }
 0x4cd   : > { %v1058_v9 = vsel %vm500_vm2, %v2622_v4, 0.0 }
 0x4ce   : > { %v2624_v5 = vpop.eup %2623 }
 0x4cf   : > { %v1067_v6 = vsel %vm500_vm2, %v2624_v5, 0.0  ;;  %v1071_v12 = vpack.c.bf16 %v2624_v5, %v2620_v1 }
 0x4d0   : > { %v2626_v10 = vpop.eup %2625  ;;  %1068 = vadd.xlane.f32.xlu1 %v1067_v6  ;;  %1059 = vadd.xlane.f32.xlu0 %v1058_v9 }
 0x4d1   : > { %v1070_v11 = vpack.c.bf16 %v2626_v10, %v2622_v4  ;;  %v1061_v13 = vsel %vm500_vm2, %v2626_v10, 0.0 }
 0x4d3   : > { %2446 = vmatprep.mubr.msk.bf16.mxu1 %vm500_vm2, %v1070_v11 }
 0x4d4   : > { %2447 = vmatmul.mubr.msk.bf16.vlgmr.msra.gmra.mxu1 %vm500_vm2, %v1071_v12  ;;  %1062 = vadd.xlane.f32.xlu1 %v1061_v13 }
 0x4d5   : > { %2462 = vmatprep.mubr.msk.bf16.mxu1 %vm2754_vm1, %v2753_v2  ;;  %2459 = vmatpush3.bf16.xpose.msra.mxu1 %v1224_v23  ;;  %v1514_v23 = vstv %s2277_s18  ;;  %s2755_s18 = smov [#allocation7]  }
 0x4d6   : > { %2460 = vmatprep.subr.bf16.mxu1 %v2753_v2  ;;  %s2685_s20 = sshll.u32 %s2755_s18, 4  ;;  %s2686_s20 = int_to_ptr.vmem [resolvable:$false] %s2685_s20 }
 0x4dd   : > { %2461 = vmatpush3.bf16.xpose.msra.mxu1 %v1221_v27 }
 0x4de   : > { %2472 = vmatprep.subr.bf16.mxu1 %v2753_v2 }
 0x555   : > { %v1066_v28 = vpop.xlane.xlu0 %1065 }
 0x556   : > { %2627 = vrcp.f32 %v1066_v28 }
 0x559   : > { %v1069_v29 = vpop.xlane.xlu1 %1068  ;;  %v1060_v31 = vpop.xlane.xlu0 %1059 }
 0x55a   : > { %2629 = vrcp.f32 %v1069_v29  ;;  %v2284_v29 = vld [vmem:[%s3256_s1 + $0xc] sm:$0xf] }
 0x55b   : > { %2631 = vrcp.f32 %v1060_v31 }
 0x55d   : > { %v1063_v32 = vpop.xlane.xlu1 %1062 }
 0x55e   : > { %2633 = vrcp.f32 %v1063_v32  ;;  %v1524_v32 = vstv %s2279_s21  ;;  %s377_s21 = sand.u32 1, %s2741_s14  }
 0x55f   : > { %s2232_s26 = sshll.u32 %s377_s21, 4  ;;  %s3215_s17 = scalar_lea.sflag [#allocation3], %s377_s21 }
 0x560   : > { %s379_s27 = scalar_lea.vmem [#allocation7], %s2232_s26  ;;  %s2687_s26 = scalar_lea.vmem %s2686_s20, 512 }
 0x561   : > { %s2140_s28 = sshll.u32 %s379_s27, 4  ;;  %s3212_s28 = int_to_ptr.vmem [resolvable:$true] %s2140_s28 }
 0x562   : > { %p2688_p8 = scmp.lt.s32.totalorder %s3212_s28, %s2686_s20 }
 0x563   : > { %v2628_v36 = vpop.eup %2627 }
 0x567   : > { %v2630_v38 = vpop.eup %2629 }
 0x568   : > { %v2632_v41 = vpop.eup %2631 }
 0x56b   : > { %v2634_v45 = vpop.eup %2633 }
 0x594   : > { %v2448_v34 = vpop.f32.mrf.mxu1 }
 0x595   : > { %v1134_v43 = vmul.f32 %v2628_v36, %v2448_v34 }
 0x596   : > { %v1113_v35 = vpop.f32.mrf.mxu1 }
 0x597   : > { %v1132_v51 = vmul.f32 %v2632_v41, %v1113_v35 }
 0x598   : > { %v2449_v39 = vpop.f32.mrf.mxu1 }
 0x599   : > { %v1135_v44 = vmul.f32 %v2630_v38, %v2449_v39  ;;  %v1665_v39 = vsel %vm408_vm0, %v2284_v29, 0 }
 0x59a   : > { %v1116_v46 = vpop.f32.mrf.mxu1 }
 0x59b   : > { %v1146_v53 = vpack.c.bf16 %v1135_v44, %v1134_v43  ;;  %v1133_v54 = vmul.f32 %v2634_v45, %v1116_v46 }
 0x59d   : > { %v1140_v56 = vpack.c.bf16 %v1133_v54, %v1132_v51  ;;  %2455 = vmatmul.mubr.msk.bf16.vlgmr.msra.gmra.mxu0 %vm679_vm3, %v1146_v53 }
 0x59e   : > { %2467 = vmatpush3.bf16.xpose.msra.mxu0 %v1272_v55  ;;  %2468 = vmatprep.mubr.msk.bf16.mxu0 %vm2754_vm1, %v2753_v2 }
 0x59f   : > { %2463 = vmatmul.mubr.msk.bf16.vlgmr.msra.gmra.mxu1 %vm679_vm3, %v1140_v56 }
 0x5a0   : > { %2473 = vmatpush3.bf16.xpose.msra.mxu1 %v1316_v57  ;;  %2474 = vmatprep.mubr.msk.bf16.mxu1 %vm2754_vm1, %v2753_v2 }
 0x5a1   : > { %2492 = vmatprep.subr.mxu1 %v2951_v20 }
 0x5a5   : > { %2469 = vmatmul.mubr.msk.bf16.vlgmr.msra.gmra.mxu0 %vm408_vm0, %v2915_v7 }
 0x5a6   : > { %2482 = vmatprep.mubr.msk.f32.mxu0 %vm500_vm2, %v2924_v8 }
 0x5a7   : > { %2475 = vmatmul.mubr.msk.bf16.vlgmr.msra.gmra.mxu1 %vm408_vm0, %v2915_v7 }
 0x5a8   : > { %2493 = vmatpush3.msra.mxu1 %v2951_v20 }
 0x5a9   : > { %2503 = vmatprep.subr.bf16.mxu1 %v2753_v2 }
 0x65d   : > { %v1200_v58 = vpop.f32.mrf.mxu0 }
 0x65f   : > { %v2456_v59 = vpop.f32.mrf.mxu0  ;;  %v1260_v60 = vpop.f32.mrf.mxu1 }
 0x660   : > { %v3111_v61 = vadd.f32 %v1260_v60, %v1200_v58 }
 0x661   : > { %v1203_v62 = vpop.f32.mrf.mxu0  ;;  %v2464_v63 = vpop.f32.mrf.mxu1 }
 0x663   : > { %v2457_v0 = vpop.f32.mrf.mxu0  ;;  %v1263_v1 = vpop.f32.mrf.mxu1 }
 0x664   : > { %v3113_v3 = vadd.f32 %v1263_v1, %v1203_v62 }
 0x665   : > { %v2465_v4 = vpop.f32.mrf.mxu1  ;;  %v1308_v5 = vpop.f32.mrf.mxu0 }
 0x666   : > { %v1515_v27 = vmul.f32 %v1514_v23, %v1308_v5 }
 0x667   : > { %v2470_v6 = vpop.f32.mrf.mxu0  ;;  %v1352_v9 = vpop.f32.mrf.mxu1 }
 0x668   : > { %v1525_v40 = vmul.f32 %v1524_v32, %v1352_v9 }
 0x669   : > { %v1311_v10 = vpop.f32.mrf.mxu0  ;;  %v2476_v11 = vpop.f32.mrf.mxu1 }
 0x66a   : > { %2478 = vmatprep.subr.mxu0 %v1311_v10  ;;  %v1516_v31 = vmul.f32 %v1514_v23, %v1311_v10 }
 0x66b   : > { %v2471_v12 = vpop.f32.mrf.mxu0  ;;  %2479 = vmatpush3.msra.mxu0 %v1311_v10  ;;  %v1355_v13 = vpop.f32.mrf.mxu1 }
 0x66c   : > { %2480 = vmatprep.subr.mxu0 %v1308_v5  ;;  %v1526_v41 = vmul.f32 %v1524_v32, %v1355_v13 }
 0x66d   : > { %2481 = vmatpush3.msra.mxu0 %v1308_v5  ;;  %v2477_v21 = vpop.f32.mrf.mxu1 }
 0x66e   : > { %2483 = vmatmul.mubr.msk.f32.vlgmr.msra.gmra.mxu0 %vm500_vm2, %v2931_v16  ;;  %2485 = vmatprep.subr.mxu0 %v1355_v13 }
 0x66f   : > { %2486 = vmatpush3.msra.mxu0 %v1355_v13  ;;  %2489 = vmatprep.mubr.msk.f32.mxu0 %vm500_vm2, %v2924_v8  ;;  %v1510_v8 = vstv %s2276_s12  ;;  %s2681_s12 = scalar_lea.vmem %s3212_s28, 256 }
 0x670   : > { %2487 = vmatprep.subr.mxu0 %v1352_v9  ;;  %p2682_p10 = scmp.ne.s32.totalorder %s3212_s28, %s2681_s12  ;;  %p2689_p11 = scmp.lt.s32.totalorder %s2687_s26, %s2681_s12 }
 0x671   : > { %2488 = vmatpush3.msra.mxu0 %v1352_v9 }
 0x672   : > { %2490 = vmatmul.mubr.msk.f32.vlgmr.msra.gmra.mxu0 %vm500_vm2, %v2931_v16  ;;  %2497 = vmatprep.subr.bf16.mxu0 %v2753_v2  ;;  %p2683_p0 = pnand %p2682_p10, %p3278_p12  ;;  %p2690_p13 = por %p2689_p11, %p2688_p8 }
 0x673   : > { %2498 = vmatpush3.bf16.xpose.msra.mxu0 %v1619_v22  ;;  %2499 = vmatprep.mubr.msk.bf16.mxu0 %vm2754_vm1, %v2753_v2 }
 0x674   : > { %2509 = vmatprep.subr.mxu0 %v2951_v20  ;;  %p2684_p7 = pneg %p2683_p0 }
 0x676   : > { %p2691_p1 = pnand %p2690_p13, %p2684_p7 }
 0x67a   : > { %2500 = vmatmul.mubr.msk.bf16.vlgmr.msra.gmra.mxu0 %vm408_vm0, %v2915_v7 }
 0x67b   : > { %2510 = vmatpush3.msra.mxu0 %v2951_v20 }
 0x72e   : > { %v2484_v16 = vpop.f32.mrf.mxu0 }
 0x72f   : > { %v1512_v24 = vmul.f32 %v2484_v16, %v1510_v8 }
 0x730   : > { %v1425_v25 = vpop.f32.mrf.mxu0 }
 0x731   : > { %v1511_v28 = vmul.f32 %v1510_v8, %v1425_v25  ;;  %v1518_v36 = vadd.f32 %v1516_v31, %v1512_v24 }
 0x732   : > { %v2491_v34 = vpop.f32.mrf.mxu0 }
 0x733   : > { %v1517_v20 = vadd.f32 %v1515_v27, %v1511_v28  ;;  %v1522_v35 = vmul.f32 %v2491_v34, %v1520_v26  ;;  %v1530_v58 = vmul.f32 %v1518_v36, %v2984_v50 }
 0x734   : > { %v1500_v38 = vpop.f32.mrf.mxu0 }
 0x735   : > { %v1521_v43 = vmul.f32 %v1520_v26, %v1500_v38  ;;  %2494 = vmatprep.mubr.msk.f32.mxu1 %vm679_vm3, %v1517_v20  ;;  %v1528_v44 = vadd.f32 %v1526_v41, %v1522_v35  ;;  %v1529_v59 = vmul.f32 %v1517_v20, %v2979_v49 }
 0x736   : > { %2495 = vmatmul.mubr.msk.f32.vlgmr.msra.gmra.mxu1 %vm679_vm3, %v1518_v36 }
 0x737   : > { %v1527_v45 = vadd.f32 %v1525_v40, %v1521_v43  ;;  %2504 = vmatpush3.bf16.xpose.msra.mxu1 %v1665_v39  ;;  %2505 = vmatprep.mubr.msk.bf16.mxu1 %vm2754_vm1, %v2753_v2 }
 0x739   : > { %v1924_v46 = vpack.c.bf16 %v1528_v44, %v1527_v45 }
 0x73a   : > { %v1655_v47 = vpop.f32.mrf.mxu0 }
 0x73b   : > { %2523 = vmatprep.subr.bf16.mxu0 %v1924_v46  ;;  %2511 = vmatprep.mubr.msk.f32.mxu0 %vm679_vm3, %v1655_v47  ;;  %v1708_v10 = vmul.f32 %v1655_v47, %v2979_v49 }
 0x73c   : > { %v2501_v51 = vpop.f32.mrf.mxu0 }
 0x73e   : > { %2506 = vmatmul.mubr.msk.bf16.vlgmr.msra.gmra.mxu1 %vm408_vm0, %v2915_v7  ;;  %v1658_v53 = vpop.f32.mrf.mxu0 }
 0x73f   : > { %2512 = vmatmul.mubr.msk.f32.vlgmr.msra.gmra.mxu0 %vm679_vm3, %v1658_v53  ;;  %v1709_v11 = vmul.f32 %v1658_v53, %v2984_v50 }
 0x740   : > { %2524 = vmatpush3.bf16.msra.mxu0 %v1924_v46  ;;  %v2502_v54 = vpop.f32.mrf.mxu0 }
 0x741   : > { %2537 = vmatprep.subr.bf16.mxu0 %v2753_v2 }
 0x7f6   : > { %v2496_v55 = vpop.f32.mrf.mxu1 }
 0x7f7   : > { %v1613_v56 = vmul.f32 %v2496_v55, %v2974_v48 }
 0x7f8   : > { %v1603_v57 = vpop.f32.mrf.mxu1 }
 0x7f9   : > { %v1612_v60 = vmul.f32 %v1603_v57, %v2989_v52  ;;  %v1615_v62 = vadd.f32 %v1613_v56, %v1530_v58 }
 0x7fb   : > { %v1614_v63 = vadd.f32 %v1612_v60, %v1529_v59 }
 0x7fd   : > { %v1819_v7 = vpack.c.bf16 %v1615_v62, %v1614_v63 }
 0x7fe   : > { %v1701_v0 = vpop.f32.mrf.mxu1 }
 0x7ff   : > { %v2513_v1 = vpop.f32.mrf.mxu0  ;;  %2546 = vmatprep.subr.msk.bf16.mxu1 %vm679_vm3, %v1819_v7  ;;  %v1827_v4 = vsel %vm679_vm3, %v1819_v7, 0  ;;  %2514 = vmatprep.mubr.msk.f32.mxu0 %vm679_vm3, %v1701_v0  ;;  %v1710_v24 = vmul.f32 %v1701_v0, %v3013_v15  ;;  %v2615_v0 = vld [vmem:[%s3257_s2 + $0x38] sm:$0xff]  }
 0x800   : > { %v2507_v5 = vpop.f32.mrf.mxu1  ;;  %v1810_v6 = vmul.f32 %v2513_v1, %v2974_v48  ;;  %2518 = vmatpush3.bf16.xpose.msra.mxu1 %v1827_v4  ;;  %v2616_v1 = vld [vmem:[%s3257_s2 + $0x28] sm:$0xff]   ;;  %v2079_v4 = vsel %vm679_vm3, %v2615_v0, 0 }
 0x801   : > { %v1790_v9 = vpop.f32.mrf.mxu0  ;;  %2529 = vmatprep.subr.bf16.mxu1 %v2753_v2  ;;  %v2011_v5 = vsel %vm679_vm3, %v2616_v1, 0 }
 0x802   : > { %v1704_v12 = vpop.f32.mrf.mxu1  ;;  %v1809_v13 = vmul.f32 %v1790_v9, %v2989_v52  ;;  %v1814_v18 = vadd.f32 %v1810_v6, %v1709_v11  ;;  %v2617_v6 = vld [vmem:[%s3257_s2 + $0x30] sm:$0xff]  }
 0x803   : > { %2515 = vmatmul.mubr.msk.f32.gmra.mxu0 %vm679_vm3, %v1704_v12  ;;  %v1711_v49 = vmul.f32 %v1704_v12, %v3018_v17  ;;  %v2076_v9 = vsel %vm679_vm3, %v2617_v6, 0 }
 0x804   : > { %v1813_v21 = vadd.f32 %v1809_v13, %v1708_v10  ;;  %v2508_v22 = vpop.f32.mrf.mxu1  ;;  %v2618_v10 = vld [vmem:[%s3257_s2 + $0x20] sm:$0xff]  }
 0x805   : > { %v2008_v11 = vsel %vm679_vm3, %v2618_v10, 0 }
 0x806   : > { %v1817_v8 = vpack.c.bf16 %v1814_v18, %v1813_v21 }
 0x808   : > { %2519 = vmatprep.mubr.msk.bf16.mxu1 %vm679_vm3, %v1817_v8 }
 0x8c3   : > { %v2516_v48 = vpop.f32.mrf.mxu0 }
 0x8c4   : > { %v1812_v23 = vmul.f32 %v2516_v48, %v3008_v14 }
 0x8c5   : > { %v1800_v16 = vpop.f32.mrf.mxu0 }
 0x8c6   : > { %v1811_v50 = vmul.f32 %v1800_v16, %v3023_v19  ;;  %v1816_v25 = vadd.f32 %v1812_v23, %v1711_v49 }
 0x8c8   : > { %v1815_v52 = vadd.f32 %v1811_v50, %v1710_v24 }
 0x8ca   : > { %v1818_v26 = vpack.c.bf16 %v1816_v25, %v1815_v52 }
 0x8cc   : > { %2520 = vmatmul.mubr.msk.bf16.vlgmr.msra.gmra.mxu1 %vm679_vm3, %v1818_v26 }
 0x8cd   : > { %2533 = vmatprep.mubr.msk.bf16.mxu1 %vm2754_vm1, %v2753_v2  ;;  %2530 = vmatpush3.bf16.xpose.msra.mxu1 %v2011_v5 }
 0x8ce   : > { %2531 = vmatprep.subr.bf16.mxu1 %v2753_v2 }
 0x8d5   : > { %2532 = vmatpush3.bf16.xpose.msra.mxu1 %v2008_v11 }
 0x98c   : > { %v2521_v27 = vpop.f32.mrf.mxu1 }
 0x98d   : > { %v1880_v29 = vmul.f32 0.35355338, %v2521_v27 }
 0x98e   : > { %v1863_v28 = vpop.f32.mrf.mxu1 }
 0x98f   : > { %v1878_v31 = vmul.f32 0.35355338, %v1863_v28  ;;  %v1884_v20 = vadd.f32 %v1880_v29, %v3035_v30 }
 0x990   : > { %v2522_v14 = vpop.f32.mrf.mxu1 }
 0x991   : > { %v1882_v32 = vadd.f32 %v1878_v31, %v3040_v33  ;;  %v1881_v34 = vmul.f32 0.35355338, %v2522_v14  ;;  %v1892_v36 = vsel %vm500_vm2, %v1884_v20, -inf }
 0x992   : > { %v1866_v15 = vpop.f32.mrf.mxu1 }
 0x993   : > { %v1879_v17 = vmul.f32 0.35355338, %v1866_v15  ;;  %v1886_v19 = vsel %vm500_vm2, %v1882_v32, -inf  ;;  %v1885_v39 = vadd.f32 %v1881_v34, %v3046_v37 }
 0x994   : > { %1887 = vmax.xlane.f32.xlu0 %v1886_v19 }
 0x995   : > { %v1883_v35 = vadd.f32 %v1879_v17, %v3053_v42  ;;  %v1895_v33 = vsel %vm500_vm2, %v1885_v39, -inf }
 0x997   : > { %v1889_v38 = vsel %vm500_vm2, %v1883_v35, -inf }
 0x998   : > { %1893 = vmax.xlane.f32.xlu0 %v1892_v36  ;;  %1890 = vmax.xlane.f32.xlu1 %v1889_v38 }
 0x99c   : > { %1896 = vmax.xlane.f32.xlu1 %v1895_v33 }
 0xa1d   : > { %v1888_v40 = vpop.xlane.xlu0 %1887 }
 0xa1e   : > { %v1898_v41 = vsub.f32 %v1882_v32, %v1888_v40 }
 0xa20   : > { %v1902_v43 = vmul.f32 1.442695, %v1898_v41 }
 0xa21   : > { %v1894_v44 = vpop.xlane.xlu0 %1893  ;;  %v1891_v45 = vpop.xlane.xlu1 %1890 }
 0xa22   : > { %2635 = vpow2.f32 %v1902_v43  ;;  %v1900_v30 = vsub.f32 %v1884_v20, %v1894_v44  ;;  %v1899_v46 = vsub.f32 %v1883_v35, %v1891_v45 }
 0xa24   : > { %v1906_v42 = vmul.f32 1.442695, %v1900_v30  ;;  %v1904_v47 = vmul.f32 1.442695, %v1899_v46 }
 0xa25   : > { %v1897_v51 = vpop.xlane.xlu1 %1896 }
 0xa26   : > { %2637 = vpow2.f32 %v1906_v42  ;;  %v1901_v53 = vsub.f32 %v1885_v39, %v1897_v51 }
 0xa27   : > { %2639 = vpow2.f32 %v1904_v47 }
 0xa28   : > { %v1908_v37 = vmul.f32 1.442695, %v1901_v53 }
 0xa2a   : > { %2641 = vpow2.f32 %v1908_v37 }
 0xa2f   : > { %v2636_v54 = vpop.eup %2635 }
 0xa30   : > { %v1910_v55 = vsel %vm500_vm2, %v2636_v54, 0.0 }
 0xa31   : > { %1911 = vadd.xlane.f32.xlu0 %v1910_v55 }
 0xa33   : > { %v2638_v56 = vpop.eup %2637 }
 0xa34   : > { %v2640_v57 = vpop.eup %2639  ;;  %v1916_v58 = vsel %vm500_vm2, %v2638_v56, 0.0 }
 0xa35   : > { %1917 = vadd.xlane.f32.xlu0 %v1916_v58  ;;  %v1913_v59 = vsel %vm500_vm2, %v2640_v57, 0.0  ;;  %v1922_v60 = vpack.c.bf16 %v2640_v57, %v2636_v54 }
 0xa36   : > { %1914 = vadd.xlane.f32.xlu1 %v1913_v59 }
 0xa37   : > { %v2642_v62 = vpop.eup %2641  ;;  %2525 = vmatprep.mubr.msk.bf16.mxu0 %vm500_vm2, %v1922_v60 }
 0xa38   : > { %v1923_v63 = vpack.c.bf16 %v2642_v62, %v2638_v56  ;;  %v1919_v7 = vsel %vm500_vm2, %v2642_v62, 0.0 }
 0xa3a   : > { %1920 = vadd.xlane.f32.xlu1 %v1919_v7  ;;  %2526 = vmatmul.mubr.msk.bf16.vlgmr.msra.gmra.mxu0 %vm500_vm2, %v1923_v63 }
 0xa3b   : > { %2541 = vmatprep.mubr.msk.bf16.mxu0 %vm2754_vm1, %v2753_v2  ;;  %2538 = vmatpush3.bf16.xpose.msra.mxu0 %v2079_v4 }
 0xa3c   : > { %2539 = vmatprep.subr.bf16.mxu0 %v2753_v2 }
 0xa43   : > { %2540 = vmatpush3.bf16.xpose.msra.mxu0 %v2076_v9 }
 0xaba   : > { %v1912_v12 = vpop.xlane.xlu0 %1911 }
 0xabe   : > { %v1918_v18 = vpop.xlane.xlu0 %1917 }
 0xabf   : > { %v1915_v13 = vpop.xlane.xlu1 %1914  ;;  %2643 = vrcp.f32 %v1918_v18 }
 0xac3   : > { %v1921_v21 = vpop.xlane.xlu1 %1920 }
 0xac4   : > { %2645 = vrcp.f32 %v1921_v21 }
 0xac5   : > { %2647 = vrcp.f32 %v1912_v12 }
 0xac6   : > { %2649 = vrcp.f32 %v1915_v13 }
 0xacc   : > { %v2644_v8 = vpop.eup %2643 }
 0xad1   : > { %v2646_v48 = vpop.eup %2645 }
 0xad2   : > { %v2648_v16 = vpop.eup %2647 }
 0xad3   : > { %v2650_v50 = vpop.eup %2649 }
 0xafa   : > { %v2527_v2 = vpop.f32.mrf.mxu0 }
 0xafb   : > { %v1986_v24 = vmul.f32 %v2644_v8, %v2527_v2 }
 0xafc   : > { %v1965_v22 = vpop.f32.mrf.mxu0 }
 0xafd   : > { %v1984_v52 = vmul.f32 %v2648_v16, %v1965_v22 }
 0xafe   : > { %v2528_v23 = vpop.f32.mrf.mxu0 }
 0xaff   : > { %v1987_v49 = vmul.f32 %v2646_v48, %v2528_v23 }
 0xb00   : > { %v1968_v25 = vpop.f32.mrf.mxu0 }
 0xb01   : > { %v2061_v26 = vpack.c.bf16 %v1987_v49, %v1986_v24  ;;  %v1985_v27 = vmul.f32 %v2650_v50, %v1968_v25 }
 0xb03   : > { %v1993_v28 = vpack.c.bf16 %v1985_v27, %v1984_v52  ;;  %2542 = vmatmul.mubr.msk.bf16.vlgmr.msra.gmra.mxu0 %vm679_vm3, %v2061_v26 }
 0xb05   : > { %2534 = vmatmul.mubr.msk.bf16.vlgmr.msra.gmra.mxu1 %vm679_vm3, %v1993_v28 }
 0xbc3   : > { %v2115_v29 = vpop.f32.mrf.mxu0 }
 0xbc5   : > { %v2047_v31 = vpop.f32.mrf.mxu1  ;;  %v2543_v14 = vpop.f32.mrf.mxu0 }
 0xbc6   : > { %v2054_v32 = vadd.f32 %v2047_v31, %v3111_v61 }
 0xbc7   : > { %v2535_v15 = vpop.f32.mrf.mxu1  ;;  %v2118_v34 = vpop.f32.mrf.mxu0 }
 0xbc8   : > { %v2122_v17 = vadd.f32 %v2115_v29, %v2054_v32 }
 0xbc9   : > { %v2050_v19 = vpop.f32.mrf.mxu1  ;;  %v2544_v20 = vpop.f32.mrf.mxu0 }
 0xbca   : > { %2124 = vst.msk [vmem:[%s379_s27] sm:$0xff] %vm408_vm0, %v2122_v17  ;;  %v2055_v35 = vadd.f32 %v2050_v19, %v3113_v3 }
 0xbcb   : > { %v2536_v36 = vpop.f32.mrf.mxu1 }
 0xbcc   : > { %v2123_v61 = vadd.f32 %v2118_v34, %v2055_v35 }
 0xbce   : > { %2125 = vst.msk [vmem:[%s379_s27 + $0x8] sm:$0xff] %vm408_vm0, %v2123_v61 }
 0xbcf   : > { %2694 = shalt.err (!%p2691_p1)
}
 0xbd0   : > { %s2695_s21 = scalar_lea.hbm %s3210_s11, 256  ;;  %s2699_s29 = scalar_lea.hbm %s3265_s10, 512 }
 0xbd1   : > { %p2696_p2 = scmp.ne.s32.totalorder %s3210_s11, %s2695_s21  ;;  %p2700_p9 = scmp.lt.s32.totalorder %s3210_s11, %s3265_s10 }
 0xbd2   : > { %p2701_p5 = scmp.lt.s32.totalorder %s2699_s29, %s2695_s21 }
 0xbd3   : > { %p2697_p3 = pnand %p2696_p2, %p3278_p12 }
 0xbd4   : > { %p2702_p6 = por %p2701_p5, %p2700_p9 }
 0xbd5   : > { %p2698_p4 = pneg %p2697_p3 }
 0xbd7   : > { %p2703_p10 = pnand %p2702_p6, %p2698_p4 }
 0xbd9   : > { %2706 = shalt.err (!%p2703_p10)
}
 0xbda   : > { %s2756_s12 = smov 128   ;;  %s2757_s20 = smov 8  }
 0xbdb   : > { %2555 = dma.vmem_to_hbm [thread:$0]  (%p3278_p12), %s3212_s28, 256, %s3210_s11, %s3215_s17, %s2756_s12, %s2756_s12, %s2757_s20  }
 0xbdc PF: > { %p2572_p0 = scmp.ge.s32.totalorder %s2749_s16, 2  ;;  %s2155_s26 = sand.u32 1, %s2737_s13  }
 0xbdd   : > { %p3279_p7 = scmp.ne.s32.totalorder %s3270_s24, 0  ;;  %s2156_s21 = scalar_lea.sflag [#allocation3], %s2155_s26 }
 0xbdf   : > { %p2565_p8 = pnand %p2572_p0, %p3279_p7 }
 0xbe1   : > { %p2566_p11 = pneg %p2565_p8 }
 0xbe3   : > { %2732 = dma.done.wait (%p2566_p11), %s2156_s21, 256  }
 0xbe4   : > { %2734 = vsyncadd (%p2566_p11), %s2156_s21, 4294967040  ;;  %p22_p13 = scmp.ge.s32.totalorder %s2838_s19, 4   ;;  %s3280_s13 = smov %s2741_s14 }
 0xbe5   : > { %s3281_s14 = smov %s2745_s15  ;;  %s3282_s15 = smov %s2849_s22 }
 0xbe6   : > { %s3283_s16 = smov %s2838_s19  ;;  %24 = sbr.rel (!%p22_p13) target bundleno = 5 (0x5), region = 114 }
 0xbeb   :  { %2161 = vsyncpa [#allocation3], 1 }
 0xbec   :  { %2163 = vsyncpa [#allocation3 + $0x1], 1 }
 0xbed   :  { %2164 = vsyncpa [#allocation4], 1 }
 0xbee   :  { %2166 = vsyncpa [#allocation4 + $0x1], 1 }
 0xbef   :  { %2167 = vsyncpa [#allocation6], 1 }

</bundles_post_ra>
